<compile_context>
chip_gen: v5e
topology: v5e:2x2
jax: 0.10.0
libtpu: 0.0.40
codegen_flags: <defaults>
</compile_context>

<pallas_src>
import functools

import numpy as np
import jax
import jax.numpy as jnp
from jax import lax
from jax.experimental import pallas as pl
from jax.experimental.pallas import tpu as pltpu

_BN_EPS = 1e-5   # must match the source module's BatchNorm2d eps


# ---------------------------------------------------------------------------
# BatchNorm (eval mode) + conv-bias folding -> per-channel scale / shift
# ---------------------------------------------------------------------------
def _fold_bn(conv_bias, gamma, beta, mean, var, eps=_BN_EPS):
    scale = gamma / jnp.sqrt(var + eps)
    shift = beta + (conv_bias - mean) * scale
    return scale, shift


def _fold_bn_np(conv_bias, gamma, beta, mean, var, eps=_BN_EPS):
    scale = gamma / np.sqrt(var + eps)
    shift = beta + (conv_bias - mean) * scale
    return scale, shift


# ---------------------------------------------------------------------------
# Fused FRDB kernel: 1x1 conv + 2-D DFT + both fu blocks, one grid step per batch group
# ---------------------------------------------------------------------------
def _frdb_kernel(featT_ref, x0_ref, combpq_ref, fbias_ref, chblk_ref, shblk_ref,
                 rowm_ref, rowp_ref, band_ref, shift_ref, o_ref, *, wc, num_blocks):
    f32 = jnp.float32

    # ---- stage 1+2: pointwise conv + 2-D ortho DFT ------------------------------
    # One bf16 MXU matmul produces P|Q side by side (N=256 fills the MXU); the H-axis
    # DFT is applied with tiny block-diagonal (bs*H, bs*H) matrices so batches stacked
    # on sublanes never mix.  Output layout: freq[row, w*C + 2c + n] (n=0 real, 1 imag).
    feat = featT_ref[0]                                                    # (bsH, E*W) bf16
    pq = jnp.dot(feat, combpq_ref[...], preferred_element_type=f32)        # (bsH, 2*W*C)
    freq = (jnp.dot(chblk_ref[...], pq[:, :wc], preferred_element_type=f32)
            + jnp.dot(shblk_ref[...], pq[:, wc:], preferred_element_type=f32)
            + fbias_ref[...])                                              # (bsH, W*C)

    rowm = rowm_ref[...]        # (bsH, bsH)  rowm @ t -> t[i-1] (0 at batch/image edge)
    rowp = rowp_ref[...]        # (bsH, bsH)  rowp @ t -> t[i+1]

    def dwconv_bn(v, layer):
        # One banded matmul delivers all three kernel-row partials (horizontal taps,
        # per-channel depthwise weights and BN scale folded in); vertical +-1 shifts
        # use the tiny block-diagonal matrices; BN shift is a pre-broadcast constant.
        t = jnp.dot(v, band_ref[layer], preferred_element_type=f32)        # (bsH, 3*W*C)
        return (jnp.dot(rowm, t[:, :wc], preferred_element_type=f32)
                + t[:, wc:2 * wc]
                + jnp.dot(rowp, t[:, 2 * wc:], preferred_element_type=f32)
                + shift_ref[layer])

    # ---- fu blocks: (dwconv+BN+ReLU) -> (dwconv+BN) + residual, all VMEM resident ----
    x = x0_ref[0]                                                          # (bsH, W*C) f32
    for i in range(num_blocks):
        y = x + freq if i == num_blocks - 1 else x
        h1 = jnp.maximum(dwconv_bn(y, 2 * i), 0.0)
        x = dwconv_bn(h1, 2 * i + 1) + x
    o_ref[0] = x


# ---------------------------------------------------------------------------
# One-time (weight-load-time) constant preparation -- hoisted out of the jitted path
# ---------------------------------------------------------------------------
def prepare_frdb_constants(params, in_channels, h, w, embed_dim, num_blocks, batches_per_step):
    cin = in_channels
    c_half = cin // 2
    wc = w * cin
    ew = embed_dim * w
    bs = batches_per_step
    bsh = bs * h
    nl = num_blocks * 2

    # --- 2-D ortho DFT bases ---
    kh, kw = np.arange(h), np.arange(w)
    ch_m = np.cos(2.0 * np.pi * np.outer(kh, kh) / h) / np.sqrt(h)
    sh_m = np.sin(2.0 * np.pi * np.outer(kh, kh) / h) / np.sqrt(h)
    cw_m = np.cos(2.0 * np.pi * np.outer(kw, kw) / w) / np.sqrt(w)
    sw_m = np.sin(2.0 * np.pi * np.outer(kw, kw) / w) / np.sqrt(w)
    # MP[w', l, n]: n=0 -> C_W[l,w'], n=1 -> -S_W[l,w'];  MQ: n=0 -> -S_W, n=1 -> -C_W
    mp = np.stack([cw_m.T, -sw_m.T], axis=-1)                          # (W, W, 2)
    mq = np.stack([-sw_m.T, -cw_m.T], axis=-1)

    w1 = np.asarray(params["conv1x1_w"], np.float64)                   # (E, C_half)
    b1 = np.asarray(params["conv1x1_b"], np.float64)                   # (C_half,)
    # Comb[e*W + w', l*(2*C_half) + 2c + n] = W1[e,c] * M[w', l, n] (pure outer product)
    comb_p = np.einsum("ec,wln->ewlcn", w1, mp).reshape(ew, wc)
    comb_q = np.einsum("ec,wln->ewlcn", w1, mq).reshape(ew, wc)
    comb_pq = np.concatenate([comb_p, comb_q], axis=1)                 # (E*W, 2*W*C)

    # 1x1-conv bias contribution to the DFT output (rank-1 terms), tiled per batch group
    bias_p = (mp.sum(axis=0)[:, None, :] * b1[None, :, None]).reshape(wc)
    bias_q = (mq.sum(axis=0)[:, None, :] * b1[None, :, None]).reshape(wc)
    fbias_h = np.outer(ch_m.sum(axis=1), bias_p) + np.outer(sh_m.sum(axis=1), bias_q)
    fbias = np.tile(fbias_h, (bs, 1))                                  # (bsH, W*C)

    # Block-diagonal DFT-over-H and +-1 row-shift matrices (batches never mix;
    # exact zero padding at the image border).
    ch_blk = np.zeros((bsh, bsh)); sh_blk = np.zeros((bsh, bsh))
    row_m = np.zeros((bsh, bsh)); row_p = np.zeros((bsh, bsh))
    for b_i in range(bs):
        s0 = b_i * h
        ch_blk[s0:s0 + h, s0:s0 + h] = ch_m
        sh_blk[s0:s0 + h, s0:s0 + h] = sh_m
        for i in range(h):
            if i - 1 >= 0:
                row_m[s0 + i, s0 + i - 1] = 1.0      # (row_m @ t)[i] = t[i-1]
            if i + 1 < h:
                row_p[s0 + i, s0 + i + 1] = 1.0      # (row_p @ t)[i] = t[i+1]

    # Banded matrices: horizontal taps + depthwise weights + folded BN scale per layer,
    # the three kernel rows concatenated along the output (lane) axis.
    bands = np.zeros((nl, wc, 3 * wc))
    shifts = np.zeros((nl, wc))
    layer = 0
    for i in range(num_blocks):
        blk = params["blocks"][i]
        for j in (1, 2):
            wk = np.asarray(blk[f"w{j}"], np.float64)                  # (3, 3, cin)
            s, t = _fold_bn_np(np.asarray(blk[f"b{j}"], np.float64),
                               np.asarray(blk[f"gamma{j}"], np.float64),
                               np.asarray(blk[f"beta{j}"], np.float64),
                               np.asarray(blk[f"mean{j}"], np.float64),
                               np.asarray(blk[f"var{j}"], np.float64))
            for kh_i in range(3):
                off = kh_i * wc
                for wp in range(w):
                    for c in range(cin):
                        col = off + wp * cin + c
                        if wp - 1 >= 0:
                            bands[layer, (wp - 1) * cin + c, col] = wk[kh_i, 0, c] * s[c]
                        bands[layer, wp * cin + c, col] = wk[kh_i, 1, c] * s[c]
                        if wp + 1 < w:
                            bands[layer, (wp + 1) * cin + c, col] = wk[kh_i, 2, c] * s[c]
            shifts[layer] = np.tile(t, w)
            layer += 1
    shift_bc = np.broadcast_to(shifts[:, None, :], (nl, bsh, wc)).copy()

    return {
        "comb_pq": jnp.asarray(comb_pq, jnp.bfloat16),   # bf16 MXU operands for the DFT stage
        "fbias":   jnp.asarray(fbias, jnp.float32),
        "ch_blk":  jnp.asarray(ch_blk, jnp.float32),
        "sh_blk":  jnp.asarray(sh_blk, jnp.float32),
        "row_m":   jnp.asarray(row_m, jnp.float32),
        "row_p":   jnp.asarray(row_p, jnp.float32),
        "bands":   jnp.asarray(bands, jnp.float32),      # conv chain kept exact in f32
        "shifts":  jnp.asarray(shift_bc, jnp.float32),
    }


def _default_batches_per_step(batch):
    """Single grid step on single-TC chips (v5e/v6e); split across the two TCs on v7x."""
    try:
        kind = jax.devices()[0].device_kind.lower()
    except Exception:
        kind = ""
    if "v7" in kind and batch % 2 == 0:
        return batch // 2
    return batch


# ---------------------------------------------------------------------------
# FRDB forward (Pallas path)
# ---------------------------------------------------------------------------
def frdb_forward(inp_nchw, feature_nchw, consts, num_blocks=2, batches_per_step=None):
    b, cin, h, w = inp_nchw.shape
    e = feature_nchw.shape[1]
    assert cin % 2 == 0
    wc = w * cin
    ew = e * w
    bs = b if batches_per_step is None else batches_per_step
    assert b % bs == 0, "batch must be divisible by batches_per_step"
    steps = b // bs
    bsh = bs * h
    nl = num_blocks * 2
    # layout requirements for clean (8,128)-tiled, lane-dense slabs
    assert bsh % 8 == 0 and wc % 128 == 0 and ew % 128 == 0, \
        "FRDB Pallas kernel requires bs*H % 8 == 0 and W*C, E*W % 128 == 0"

    # --- cheap layout glue: NCHW -> lane-dense slabs, batch group stacked on sublanes ---
    feat_t = (jnp.transpose(feature_nchw, (0, 2, 1, 3))
              .reshape(steps, bsh, ew).astype(jnp.bfloat16))
    x0 = jnp.transpose(inp_nchw, (0, 2, 3, 1)).reshape(steps, bsh, wc).astype(jnp.float32)

    kern = functools.partial(_frdb_kernel, wc=wc, num_blocks=num_blocks)
    out = pl.pallas_call(
        kern,
        out_shape=jax.ShapeDtypeStruct((steps, bsh, wc), jnp.float32),
        grid_spec=pltpu.PrefetchScalarGridSpec(
            num_scalar_prefetch=0,
            grid=(steps,),
            in_specs=[
                pl.BlockSpec((1, bsh, ew), lambda i: (i, 0, 0)),        # feat  (per step)
                pl.BlockSpec((1, bsh, wc), lambda i: (i, 0, 0)),        # x0    (per step)
                pl.BlockSpec((ew, 2 * wc), lambda i: (0, 0)),           # CombP|CombQ (bf16)
                pl.BlockSpec((bsh, wc), lambda i: (0, 0)),              # DFT bias term
                pl.BlockSpec((bsh, bsh), lambda i: (0, 0)),             # C_H  block-diag
                pl.BlockSpec((bsh, bsh), lambda i: (0, 0)),             # S_H  block-diag
                pl.BlockSpec((bsh, bsh), lambda i: (0, 0)),             # row -1 shift
                pl.BlockSpec((bsh, bsh), lambda i: (0, 0)),             # row +1 shift
                pl.BlockSpec((nl, wc, 3 * wc), lambda i: (0, 0, 0)),    # banded dw+BN-scale
                pl.BlockSpec((nl, bsh, wc), lambda i: (0, 0, 0)),       # BN shift (pre-bcast)
            ],
            out_specs=pl.BlockSpec((1, bsh, wc), lambda i: (i, 0, 0)),
        ),
        compiler_params=pltpu.CompilerParams(dimension_semantics=("parallel",)),
    )(feat_t, x0, consts["comb_pq"], consts["fbias"], consts["ch_blk"], consts["sh_blk"],
      consts["row_m"], consts["row_p"], consts["bands"], consts["shifts"])

    return jnp.transpose(out.reshape(b, h, w, cin), (0, 3, 1, 2))   # back to NCHW


# ---------------------------------------------------------------------------
# Parameters (deterministic)
# ---------------------------------------------------------------------------
def init_frdb_params(key, in_channels, out_channels, embed_dim, num_blocks=2):
    assert out_channels == in_channels, "residual structure requires out == in"
    assert in_channels % 2 == 0
    c_half = in_channels // 2
    keys = jax.random.split(key, 2 + 12 * num_blocks)
    p = {
        "conv1x1_w": jax.random.normal(keys[0], (embed_dim, c_half), jnp.float32)
                     / np.sqrt(embed_dim),
        "conv1x1_b": 0.01 * jax.random.normal(keys[1], (c_half,), jnp.float32),
        "blocks": [],
    }
    k = 2
    for _ in range(num_blocks):
        blk = {}
        for j in (1, 2):
            blk[f"w{j}"] = jax.random.normal(keys[k], (3, 3, in_channels), jnp.float32) / 3.0
            blk[f"b{j}"] = 0.01 * jax.random.normal(keys[k + 1], (in_channels,), jnp.float32)
            blk[f"gamma{j}"] = 1.0 + 0.1 * jax.random.normal(keys[k + 2], (in_channels,), jnp.float32)
            blk[f"beta{j}"] = 0.01 * jax.random.normal(keys[k + 3], (in_channels,), jnp.float32)
            blk[f"mean{j}"] = 0.05 * jax.random.normal(keys[k + 4], (in_channels,), jnp.float32)
            blk[f"var{j}"] = 1.0 + 0.2 * jnp.abs(jax.random.normal(keys[k + 5], (in_channels,), jnp.float32))
            k += 6
        p["blocks"].append(blk)
    return p


# ---------------------------------------------------------------------------
# Pure-JAX reference (mirrors the PyTorch forward in NCHW)
# ---------------------------------------------------------------------------
def frdb_reference(inp_nchw, feature_nchw, params, num_blocks=2):
    b, cin, h, w = inp_nchw.shape
    hp = jax.lax.Precision.HIGHEST

    fea = jnp.einsum("behw,eo->bohw", feature_nchw, params["conv1x1_w"], precision=hp) \
          + params["conv1x1_b"][None, :, None, None]
    f = jnp.fft.fft2(fea, norm="ortho")
    freq = jnp.stack((jnp.real(f), jnp.imag(f)), axis=2).reshape(b, cin, h, w)

    def dwconv(xx, w33c):
        wk = jnp.transpose(w33c, (2, 0, 1))[:, None, :, :]       # (C, 1, 3, 3) OIHW
        return lax.conv_general_dilated(
            xx, wk, window_strides=(1, 1), padding="SAME",
            dimension_numbers=("NCHW", "OIHW", "NCHW"),
            feature_group_count=cin, precision=hp)

    x = inp_nchw.astype(jnp.float32)
    for i in range(num_blocks):
        blk = params["blocks"][i]
        s1, t1 = _fold_bn(blk["b1"], blk["gamma1"], blk["beta1"], blk["mean1"], blk["var1"])
        s2, t2 = _fold_bn(blk["b2"], blk["gamma2"], blk["beta2"], blk["mean2"], blk["var2"])
        y = x + freq if i == num_blocks - 1 else x
        h1 = jnp.maximum(dwconv(y, blk["w1"]) * s1[None, :, None, None]
                         + t1[None, :, None, None], 0.0)
        x = dwconv(h1, blk["w2"]) * s2[None, :, None, None] + t2[None, :, None, None] + x
    return x


if __name__ == "__main__":
    B, CIN, EMBED, H, W = 2, 8, 16, 16, 16
    NUM_BLOCKS = 2

    key = jax.random.PRNGKey(0)
    k_inp, k_feat, k_par = jax.random.split(key, 3)
    inp = jax.random.normal(k_inp, (B, CIN, H, W), jnp.float32)
    feature = jax.random.normal(k_feat, (B, EMBED, H, W), jnp.float32)
    params = init_frdb_params(k_par, CIN, CIN, EMBED, NUM_BLOCKS)

    bs = _default_batches_per_step(B)
    # parameter-only preprocessing hoisted out of the per-call path (done once here)
    consts = prepare_frdb_constants(params, CIN, H, W, EMBED, NUM_BLOCKS, bs)

    fwd = jax.jit(functools.partial(frdb_forward, num_blocks=NUM_BLOCKS, batches_per_step=bs))
    out = jax.block_until_ready(fwd(inp, feature, consts))
    ref = jax.block_until_ready(frdb_reference(inp, feature, params, NUM_BLOCKS))

    assert out.shape == (B, CIN, H, W)
    if not np.allclose(np.asarray(out), np.asarray(ref), rtol=2e-2, atol=2e-2):
        err = float(np.max(np.abs(np.asarray(out) - np.asarray(ref))))
        raise AssertionError(f"Pallas FRDB output mismatch vs JAX reference (max abs err {err:.3e})")
    print("KERNEL_OK")
</pallas_src>

<mosaic_0001>
module attributes {stable_mosaic.version = 11 : i64} {
  func.func @_frdb_kernel(%arg0: i32, %arg1: memref<1x32x256xbf16, #tpu.memory_space<vmem>>, %arg2: memref<1x32x128xf32, #tpu.memory_space<vmem>>, %arg3: memref<256x256xbf16, #tpu.memory_space<vmem>>, %arg4: memref<32x128xf32, #tpu.memory_space<vmem>>, %arg5: memref<32x32xf32, #tpu.memory_space<vmem>>, %arg6: memref<32x32xf32, #tpu.memory_space<vmem>>, %arg7: memref<32x32xf32, #tpu.memory_space<vmem>>, %arg8: memref<32x32xf32, #tpu.memory_space<vmem>>, %arg9: memref<4x128x384xf32, #tpu.memory_space<vmem>>, %arg10: memref<4x32x128xf32, #tpu.memory_space<vmem>>, %arg11: memref<1x32x128xf32, #tpu.memory_space<vmem>>) attributes {dimension_semantics = [#tpu.dimension_semantics<parallel>], iteration_bounds = array<i64: 1>, scalar_prefetch = 0 : i64, scratch_operands = 0 : i64, tpu.core_type = #tpu.core_type<tc>, window_params = [{transform_indices = @transform_0, window_bounds = array<i64: 1, 32, 256>}, {transform_indices = @transform_1, window_bounds = array<i64: 1, 32, 128>}, {pipeline_mode = #tpu.pipeline_mode<synchronous>, transform_indices = @transform_2, window_bounds = array<i64: 256, 256>}, {pipeline_mode = #tpu.pipeline_mode<synchronous>, transform_indices = @transform_3, window_bounds = array<i64: 32, 128>}, {pipeline_mode = #tpu.pipeline_mode<synchronous>, transform_indices = @transform_4, window_bounds = array<i64: 32, 32>}, {pipeline_mode = #tpu.pipeline_mode<synchronous>, transform_indices = @transform_5, window_bounds = array<i64: 32, 32>}, {pipeline_mode = #tpu.pipeline_mode<synchronous>, transform_indices = @transform_6, window_bounds = array<i64: 32, 32>}, {pipeline_mode = #tpu.pipeline_mode<synchronous>, transform_indices = @transform_7, window_bounds = array<i64: 32, 32>}, {pipeline_mode = #tpu.pipeline_mode<synchronous>, transform_indices = @transform_8, window_bounds = array<i64: 4, 128, 384>}, {pipeline_mode = #tpu.pipeline_mode<synchronous>, transform_indices = @transform_9, window_bounds = array<i64: 4, 32, 128>}, {transform_indices = @transform_10, window_bounds = array<i64: 1, 32, 128>}]} {
    %c0 = arith.constant 0 : index
    %c0_0 = arith.constant 0 : index
    %c0_1 = arith.constant 0 : index
    %0 = vector.load %arg1[%c0, %c0_0, %c0_1] : memref<1x32x256xbf16, #tpu.memory_space<vmem>>, vector<1x32x256xbf16>
    %1 = vector.shape_cast %0 : vector<1x32x256xbf16> to vector<32x256xbf16>
    %c0_2 = arith.constant 0 : index
    %c0_3 = arith.constant 0 : index
    %2 = vector.load %arg3[%c0_2, %c0_3] : memref<256x256xbf16, #tpu.memory_space<vmem>>, vector<256x256xbf16>
    %cst = arith.constant dense<0.000000e+00> : vector<32x256xf32>
    %3 = tpu.matmul %1, %2, %cst {dimension_numbers = #tpu.dot_dimension_numbers<[1], [0], [0], [1], [0, 0, 1, 1], [], []>} : vector<32x256xbf16>, vector<256x256xbf16>, vector<32x256xf32> -> vector<32x256xf32>
    %c0_4 = arith.constant 0 : index
    %c0_5 = arith.constant 0 : index
    %4 = vector.load %arg5[%c0_4, %c0_5] : memref<32x32xf32, #tpu.memory_space<vmem>>, vector<32x32xf32>
    %5 = vector.extract_strided_slice %3 {offsets = [0, 0], sizes = [32, 128], strides = [1, 1]} : vector<32x256xf32> to vector<32x128xf32>
    %cst_6 = arith.constant dense<0.000000e+00> : vector<32x128xf32>
    %6 = tpu.matmul %4, %5, %cst_6 {dimension_numbers = #tpu.dot_dimension_numbers<[1], [0], [0], [1], [0, 0, 1, 1], [], []>} : vector<32x32xf32>, vector<32x128xf32>, vector<32x128xf32> -> vector<32x128xf32>
    %c0_7 = arith.constant 0 : index
    %c0_8 = arith.constant 0 : index
    %7 = vector.load %arg6[%c0_7, %c0_8] : memref<32x32xf32, #tpu.memory_space<vmem>>, vector<32x32xf32>
    %8 = vector.extract_strided_slice %3 {offsets = [0, 128], sizes = [32, 128], strides = [1, 1]} : vector<32x256xf32> to vector<32x128xf32>
    %cst_9 = arith.constant dense<0.000000e+00> : vector<32x128xf32>
    %9 = tpu.matmul %7, %8, %cst_9 {dimension_numbers = #tpu.dot_dimension_numbers<[1], [0], [0], [1], [0, 0, 1, 1], [], []>} : vector<32x32xf32>, vector<32x128xf32>, vector<32x128xf32> -> vector<32x128xf32>
    %10 = arith.addf %6, %9 : vector<32x128xf32>
    %c0_10 = arith.constant 0 : index
    %c0_11 = arith.constant 0 : index
    %11 = vector.load %arg4[%c0_10, %c0_11] : memref<32x128xf32, #tpu.memory_space<vmem>>, vector<32x128xf32>
    %12 = arith.addf %10, %11 : vector<32x128xf32>
    %c0_12 = arith.constant 0 : index
    %c0_13 = arith.constant 0 : index
    %13 = vector.load %arg7[%c0_12, %c0_13] : memref<32x32xf32, #tpu.memory_space<vmem>>, vector<32x32xf32>
    %c0_14 = arith.constant 0 : index
    %c0_15 = arith.constant 0 : index
    %14 = vector.load %arg8[%c0_14, %c0_15] : memref<32x32xf32, #tpu.memory_space<vmem>>, vector<32x32xf32>
    %c0_16 = arith.constant 0 : index
    %c0_17 = arith.constant 0 : index
    %c0_18 = arith.constant 0 : index
    %15 = vector.load %arg2[%c0_16, %c0_17, %c0_18] : memref<1x32x128xf32, #tpu.memory_space<vmem>>, vector<1x32x128xf32>
    %16 = vector.shape_cast %15 : vector<1x32x128xf32> to vector<32x128xf32>
    %c0_19 = arith.constant 0 : index
    %c0_20 = arith.constant 0 : index
    %c0_21 = arith.constant 0 : index
    %17 = vector.load %arg9[%c0_19, %c0_20, %c0_21] : memref<4x128x384xf32, #tpu.memory_space<vmem>>, vector<1x128x384xf32>
    %18 = vector.shape_cast %17 : vector<1x128x384xf32> to vector<128x384xf32>
    %cst_22 = arith.constant dense<0.000000e+00> : vector<32x384xf32>
    %19 = tpu.matmul %16, %18, %cst_22 {dimension_numbers = #tpu.dot_dimension_numbers<[1], [0], [0], [1], [0, 0, 1, 1], [], []>} : vector<32x128xf32>, vector<128x384xf32>, vector<32x384xf32> -> vector<32x384xf32>
    %20 = vector.extract_strided_slice %19 {offsets = [0, 0], sizes = [32, 128], strides = [1, 1]} : vector<32x384xf32> to vector<32x128xf32>
    %cst_23 = arith.constant dense<0.000000e+00> : vector<32x128xf32>
    %21 = tpu.matmul %13, %20, %cst_23 {dimension_numbers = #tpu.dot_dimension_numbers<[1], [0], [0], [1], [0, 0, 1, 1], [], []>} : vector<32x32xf32>, vector<32x128xf32>, vector<32x128xf32> -> vector<32x128xf32>
    %22 = vector.extract_strided_slice %19 {offsets = [0, 128], sizes = [32, 128], strides = [1, 1]} : vector<32x384xf32> to vector<32x128xf32>
    %23 = arith.addf %21, %22 : vector<32x128xf32>
    %24 = vector.extract_strided_slice %19 {offsets = [0, 256], sizes = [32, 128], strides = [1, 1]} : vector<32x384xf32> to vector<32x128xf32>
    %cst_24 = arith.constant dense<0.000000e+00> : vector<32x128xf32>
    %25 = tpu.matmul %14, %24, %cst_24 {dimension_numbers = #tpu.dot_dimension_numbers<[1], [0], [0], [1], [0, 0, 1, 1], [], []>} : vector<32x32xf32>, vector<32x128xf32>, vector<32x128xf32> -> vector<32x128xf32>
    %26 = arith.addf %23, %25 : vector<32x128xf32>
    %c0_25 = arith.constant 0 : index
    %c0_26 = arith.constant 0 : index
    %c0_27 = arith.constant 0 : index
    %27 = vector.load %arg10[%c0_25, %c0_26, %c0_27] : memref<4x32x128xf32, #tpu.memory_space<vmem>>, vector<1x32x128xf32>
    %28 = vector.shape_cast %27 : vector<1x32x128xf32> to vector<32x128xf32>
    %29 = arith.addf %26, %28 : vector<32x128xf32>
    %cst_28 = arith.constant 0.000000e+00 : f32
    %30 = vector.broadcast %cst_28 : f32 to vector<32x128xf32>
    %31 = arith.maximumf %29, %30 : vector<32x128xf32>
    %c1 = arith.constant 1 : index
    %c0_29 = arith.constant 0 : index
    %c0_30 = arith.constant 0 : index
    %32 = vector.load %arg9[%c1, %c0_29, %c0_30] : memref<4x128x384xf32, #tpu.memory_space<vmem>>, vector<1x128x384xf32>
    %33 = vector.shape_cast %32 : vector<1x128x384xf32> to vector<128x384xf32>
    %cst_31 = arith.constant dense<0.000000e+00> : vector<32x384xf32>
    %34 = tpu.matmul %31, %33, %cst_31 {dimension_numbers = #tpu.dot_dimension_numbers<[1], [0], [0], [1], [0, 0, 1, 1], [], []>} : vector<32x128xf32>, vector<128x384xf32>, vector<32x384xf32> -> vector<32x384xf32>
    %35 = vector.extract_strided_slice %34 {offsets = [0, 0], sizes = [32, 128], strides = [1, 1]} : vector<32x384xf32> to vector<32x128xf32>
    %cst_32 = arith.constant dense<0.000000e+00> : vector<32x128xf32>
    %36 = tpu.matmul %13, %35, %cst_32 {dimension_numbers = #tpu.dot_dimension_numbers<[1], [0], [0], [1], [0, 0, 1, 1], [], []>} : vector<32x32xf32>, vector<32x128xf32>, vector<32x128xf32> -> vector<32x128xf32>
    %37 = vector.extract_strided_slice %34 {offsets = [0, 128], sizes = [32, 128], strides = [1, 1]} : vector<32x384xf32> to vector<32x128xf32>
    %38 = arith.addf %36, %37 : vector<32x128xf32>
    %39 = vector.extract_strided_slice %34 {offsets = [0, 256], sizes = [32, 128], strides = [1, 1]} : vector<32x384xf32> to vector<32x128xf32>
    %cst_33 = arith.constant dense<0.000000e+00> : vector<32x128xf32>
    %40 = tpu.matmul %14, %39, %cst_33 {dimension_numbers = #tpu.dot_dimension_numbers<[1], [0], [0], [1], [0, 0, 1, 1], [], []>} : vector<32x32xf32>, vector<32x128xf32>, vector<32x128xf32> -> vector<32x128xf32>
    %41 = arith.addf %38, %40 : vector<32x128xf32>
    %c1_34 = arith.constant 1 : index
    %c0_35 = arith.constant 0 : index
    %c0_36 = arith.constant 0 : index
    %42 = vector.load %arg10[%c1_34, %c0_35, %c0_36] : memref<4x32x128xf32, #tpu.memory_space<vmem>>, vector<1x32x128xf32>
    %43 = vector.shape_cast %42 : vector<1x32x128xf32> to vector<32x128xf32>
    %44 = arith.addf %41, %43 : vector<32x128xf32>
    %45 = arith.addf %44, %16 : vector<32x128xf32>
    %46 = arith.addf %45, %12 : vector<32x128xf32>
    %c2 = arith.constant 2 : index
    %c0_37 = arith.constant 0 : index
    %c0_38 = arith.constant 0 : index
    %47 = vector.load %arg9[%c2, %c0_37, %c0_38] : memref<4x128x384xf32, #tpu.memory_space<vmem>>, vector<1x128x384xf32>
    %48 = vector.shape_cast %47 : vector<1x128x384xf32> to vector<128x384xf32>
    %cst_39 = arith.constant dense<0.000000e+00> : vector<32x384xf32>
    %49 = tpu.matmul %46, %48, %cst_39 {dimension_numbers = #tpu.dot_dimension_numbers<[1], [0], [0], [1], [0, 0, 1, 1], [], []>} : vector<32x128xf32>, vector<128x384xf32>, vector<32x384xf32> -> vector<32x384xf32>
    %50 = vector.extract_strided_slice %49 {offsets = [0, 0], sizes = [32, 128], strides = [1, 1]} : vector<32x384xf32> to vector<32x128xf32>
    %cst_40 = arith.constant dense<0.000000e+00> : vector<32x128xf32>
    %51 = tpu.matmul %13, %50, %cst_40 {dimension_numbers = #tpu.dot_dimension_numbers<[1], [0], [0], [1], [0, 0, 1, 1], [], []>} : vector<32x32xf32>, vector<32x128xf32>, vector<32x128xf32> -> vector<32x128xf32>
    %52 = vector.extract_strided_slice %49 {offsets = [0, 128], sizes = [32, 128], strides = [1, 1]} : vector<32x384xf32> to vector<32x128xf32>
    %53 = arith.addf %51, %52 : vector<32x128xf32>
    %54 = vector.extract_strided_slice %49 {offsets = [0, 256], sizes = [32, 128], strides = [1, 1]} : vector<32x384xf32> to vector<32x128xf32>
    %cst_41 = arith.constant dense<0.000000e+00> : vector<32x128xf32>
    %55 = tpu.matmul %14, %54, %cst_41 {dimension_numbers = #tpu.dot_dimension_numbers<[1], [0], [0], [1], [0, 0, 1, 1], [], []>} : vector<32x32xf32>, vector<32x128xf32>, vector<32x128xf32> -> vector<32x128xf32>
    %56 = arith.addf %53, %55 : vector<32x128xf32>
    %c2_42 = arith.constant 2 : index
    %c0_43 = arith.constant 0 : index
    %c0_44 = arith.constant 0 : index
    %57 = vector.load %arg10[%c2_42, %c0_43, %c0_44] : memref<4x32x128xf32, #tpu.memory_space<vmem>>, vector<1x32x128xf32>
    %58 = vector.shape_cast %57 : vector<1x32x128xf32> to vector<32x128xf32>
    %59 = arith.addf %56, %58 : vector<32x128xf32>
    %cst_45 = arith.constant 0.000000e+00 : f32
    %60 = vector.broadcast %cst_45 : f32 to vector<32x128xf32>
    %61 = arith.maximumf %59, %60 : vector<32x128xf32>
    %c3 = arith.constant 3 : index
    %c0_46 = arith.constant 0 : index
    %c0_47 = arith.constant 0 : index
    %62 = vector.load %arg9[%c3, %c0_46, %c0_47] : memref<4x128x384xf32, #tpu.memory_space<vmem>>, vector<1x128x384xf32>
    %63 = vector.shape_cast %62 : vector<1x128x384xf32> to vector<128x384xf32>
    %cst_48 = arith.constant dense<0.000000e+00> : vector<32x384xf32>
    %64 = tpu.matmul %61, %63, %cst_48 {dimension_numbers = #tpu.dot_dimension_numbers<[1], [0], [0], [1], [0, 0, 1, 1], [], []>} : vector<32x128xf32>, vector<128x384xf32>, vector<32x384xf32> -> vector<32x384xf32>
    %65 = vector.extract_strided_slice %64 {offsets = [0, 0], sizes = [32, 128], strides = [1, 1]} : vector<32x384xf32> to vector<32x128xf32>
    %cst_49 = arith.constant dense<0.000000e+00> : vector<32x128xf32>
    %66 = tpu.matmul %13, %65, %cst_49 {dimension_numbers = #tpu.dot_dimension_numbers<[1], [0], [0], [1], [0, 0, 1, 1], [], []>} : vector<32x32xf32>, vector<32x128xf32>, vector<32x128xf32> -> vector<32x128xf32>
    %67 = vector.extract_strided_slice %64 {offsets = [0, 128], sizes = [32, 128], strides = [1, 1]} : vector<32x384xf32> to vector<32x128xf32>
    %68 = arith.addf %66, %67 : vector<32x128xf32>
    %69 = vector.extract_strided_slice %64 {offsets = [0, 256], sizes = [32, 128], strides = [1, 1]} : vector<32x384xf32> to vector<32x128xf32>
    %cst_50 = arith.constant dense<0.000000e+00> : vector<32x128xf32>
    %70 = tpu.matmul %14, %69, %cst_50 {dimension_numbers = #tpu.dot_dimension_numbers<[1], [0], [0], [1], [0, 0, 1, 1], [], []>} : vector<32x32xf32>, vector<32x128xf32>, vector<32x128xf32> -> vector<32x128xf32>
    %71 = arith.addf %68, %70 : vector<32x128xf32>
    %c3_51 = arith.constant 3 : index
    %c0_52 = arith.constant 0 : index
    %c0_53 = arith.constant 0 : index
    %72 = vector.load %arg10[%c3_51, %c0_52, %c0_53] : memref<4x32x128xf32, #tpu.memory_space<vmem>>, vector<1x32x128xf32>
    %73 = vector.shape_cast %72 : vector<1x32x128xf32> to vector<32x128xf32>
    %74 = arith.addf %71, %73 : vector<32x128xf32>
    %75 = arith.addf %74, %45 : vector<32x128xf32>
    %c0_54 = arith.constant 0 : index
    %c0_55 = arith.constant 0 : index
    %c0_56 = arith.constant 0 : index
    %76 = vector.load %arg11[%c0_54, %c0_55, %c0_56] : memref<1x32x128xf32, #tpu.memory_space<vmem>>, vector<1x32x128xf32>
    %77 = vector.shape_cast %76 : vector<1x32x128xf32> to vector<32x128xf32>
    %78 = vector.shape_cast %75 : vector<32x128xf32> to vector<1x32x128xf32>
    tpu.vector_store %arg11[%c0_54, %c0_55, %c0_56], %78 {strides = array<i32>} : memref<1x32x128xf32, #tpu.memory_space<vmem>>, vector<1x32x128xf32>,
    return
  }
  func.func @transform_0(%arg0: i32) -> (i32, i32, i32) {
    %c0_i32 = arith.constant 0 : i32
    %c0_i32_0 = arith.constant 0 : i32
    %c0_i32_1 = arith.constant 0 : i32
    return %arg0, %c0_i32, %c0_i32_0 : i32, i32, i32
  }
  func.func @transform_1(%arg0: i32) -> (i32, i32, i32) {
    %c0_i32 = arith.constant 0 : i32
    %c0_i32_0 = arith.constant 0 : i32
    %c0_i32_1 = arith.constant 0 : i32
    return %arg0, %c0_i32, %c0_i32_0 : i32, i32, i32
  }
  func.func @transform_2(%arg0: i32) -> (i32, i32) {
    %c0_i32 = arith.constant 0 : i32
    %c0_i32_0 = arith.constant 0 : i32
    %c0_i32_1 = arith.constant 0 : i32
    return %c0_i32, %c0_i32_0 : i32, i32
  }
  func.func @transform_3(%arg0: i32) -> (i32, i32) {
    %c0_i32 = arith.constant 0 : i32
    %c0_i32_0 = arith.constant 0 : i32
    %c0_i32_1 = arith.constant 0 : i32
    return %c0_i32, %c0_i32_0 : i32, i32
  }
  func.func @transform_4(%arg0: i32) -> (i32, i32) {
    %c0_i32 = arith.constant 0 : i32
    %c0_i32_0 = arith.constant 0 : i32
    %c0_i32_1 = arith.constant 0 : i32
    return %c0_i32, %c0_i32_0 : i32, i32
  }
  func.func @transform_5(%arg0: i32) -> (i32, i32) {
    %c0_i32 = arith.constant 0 : i32
    %c0_i32_0 = arith.constant 0 : i32
    %c0_i32_1 = arith.constant 0 : i32
    return %c0_i32, %c0_i32_0 : i32, i32
  }
  func.func @transform_6(%arg0: i32) -> (i32, i32) {
    %c0_i32 = arith.constant 0 : i32
    %c0_i32_0 = arith.constant 0 : i32
    %c0_i32_1 = arith.constant 0 : i32
    return %c0_i32, %c0_i32_0 : i32, i32
  }
  func.func @transform_7(%arg0: i32) -> (i32, i32) {
    %c0_i32 = arith.constant 0 : i32
    %c0_i32_0 = arith.constant 0 : i32
    %c0_i32_1 = arith.constant 0 : i32
    return %c0_i32, %c0_i32_0 : i32, i32
  }
  func.func @transform_8(%arg0: i32) -> (i32, i32, i32) {
    %c0_i32 = arith.constant 0 : i32
    %c0_i32_0 = arith.constant 0 : i32
    %c0_i32_1 = arith.constant 0 : i32
    %c0_i32_2 = arith.constant 0 : i32
    return %c0_i32, %c0_i32_0, %c0_i32_1 : i32, i32, i32
  }
  func.func @transform_9(%arg0: i32) -> (i32, i32, i32) {
    %c0_i32 = arith.constant 0 : i32
    %c0_i32_0 = arith.constant 0 : i32
    %c0_i32_1 = arith.constant 0 : i32
    %c0_i32_2 = arith.constant 0 : i32
    return %c0_i32, %c0_i32_0, %c0_i32_1 : i32, i32, i32
  }
  func.func @transform_10(%arg0: i32) -> (i32, i32, i32) {
    %c0_i32 = arith.constant 0 : i32
    %c0_i32_0 = arith.constant 0 : i32
    %c0_i32_1 = arith.constant 0 : i32
    return %arg0, %c0_i32, %c0_i32_0 : i32, i32, i32
  }
}

</mosaic_0001>

<bundles_post_ra>
// kernel: frdb_forward.1
= control target key start
LH: loop header
LB: loop body
LE: loop exit
PB: predicated region body
PF: predicated region fallthrough
CT: control target
= control target key end

     0   :  { %15 = vsyncpa [#allocation3], 0  ;;  %s1606_s16 = smov [#allocation2]   ;;  %s1607_s18 = smov 384   ;;  %s2166_s0 = inlined_call_operand.vmem [shape: bf16[1,32,256], index: 0, kind: input, shape index: {}]   ;;  %s2167_s1 = inlined_call_operand.vmem [shape: f32[1,32,128], index: 1, kind: input, shape index: {}]   ;;  %s2168_s2 = inlined_call_operand.vmem [shape: bf16[256,256], index: 2, kind: input, shape index: {}]   ;;  %s2169_s3 = inlined_call_operand.vmem [shape: f32[32,128], index: 3, kind: input, shape index: {}]   ;;  %s2170_s4 = inlined_call_operand.vmem [shape: f32[32,32], index: 4, kind: input, shape index: {}]   ;;  %s2171_s5 = inlined_call_operand.vmem [shape: f32[32,32], index: 5, kind: input, shape index: {}]   ;;  %s2172_s6 = inlined_call_operand.vmem [shape: f32[32,32], index: 6, kind: input, shape index: {}]   ;;  %s2173_s7 = inlined_call_operand.vmem [shape: f32[32,32], index: 7, kind: input, shape index: {}]   ;;  %s2174_s8 = inlined_call_operand.hbm [shape: f32[4,128,384], index: 8, kind: input, shape index: {}]   ;;  %s2175_s9 = inlined_call_operand.vmem [shape: f32[4,32,128], index: 9, kind: input, shape index: {}]   ;;  %s2176_s10 = inlined_call_operand.vmem [shape: f32[1,32,128], index: 10, kind: output, shape index: {}]  }
   0x1   :  { %s36_s15 = sshll.u32 %s2174_s8, 4  ;;  %s38_s17 = sshll.u32 %s1606_s16, 4  ;;  %s37_s15 = int_to_ptr.hbm [resolvable:$true] %s36_s15  ;;  %s39_s17 = int_to_ptr.vmem [resolvable:$true] %s38_s17 }
   0x2   :  { %s1608_s19 = smov 24  }
   0x3   :  { %44 = dma.hbm_to_vmem [thread:$0]  %s37_s15, 24576, %s39_s17, [#allocation3], %s1607_s18, %s1607_s18, %s1608_s19  }
   0x4   :  { %1604 = dma.done.wait [#allocation3], 24576  }
   0x5   :  { %1605 = vsyncadd [#allocation3], 4294942720  ;;  %v1547_v0 = vld [vmem:[%s2168_s2 + $0x74] sm:$0xf]  ;;  %v1409_v1 = vld [vmem:[%s2168_s2 + $0x78] sm:$0xf0] }
   0x6   :  { %v1563_v2 = vld [vmem:[%s2168_s2 + $0xf4] sm:$0xf]  ;;  %v1412_v3 = vor.u32 %v1547_v0, %v1409_v1  ;;  %v1473_v4 = vld [vmem:[%s2168_s2 + $0xf8] sm:$0xf0]  ;;  %v1545_v5 = vld [vmem:[%s2168_s2 + $0x64] sm:$0xf] }
   0x7   :  { %v1401_v6 = vld [vmem:[%s2168_s2 + $0x68] sm:$0xf0]  ;;  %v1476_v7 = vor.u32 %v1563_v2, %v1473_v4  ;;  %v1561_v8 = vld [vmem:[%s2168_s2 + $0xe4] sm:$0xf]  ;;  %v1407_v10 = vld [vmem:[%s2168_s2 + $0x70] sm:$0xf] }
   0x8   :  { %v1465_v9 = vld [vmem:[%s2168_s2 + $0xe8] sm:$0xf0]  ;;  %305 = vmatpush.bf16.msra.mxu2 %v1412_v3  ;;  %v1404_v11 = vor.u32 %v1545_v5, %v1401_v6  ;;  %v1548_v12 = vld [vmem:[%s2168_s2 + $0x74] sm:$0xf0]  ;;  %v1471_v13 = vld [vmem:[%s2168_s2 + $0xf0] sm:$0xf] }
   0x9   :  { %v1564_v14 = vld [vmem:[%s2168_s2 + $0xf4] sm:$0xf0]  ;;  %324 = vmatpush.bf16.msra.mxu3 %v1476_v7  ;;  %v1468_v15 = vor.u32 %v1561_v8, %v1465_v9  ;;  %v1408_v16 = vor.u32 %v1548_v12, %v1407_v10  ;;  %v1543_v18 = vld [vmem:[%s2168_s2 + $0x54] sm:$0xf]  ;;  %v1393_v19 = vld [vmem:[%s2168_s2 + $0x58] sm:$0xf0] }
   0xa   :  { %v1472_v17 = vor.u32 %v1564_v14, %v1471_v13  ;;  %v1559_v20 = vld [vmem:[%s2168_s2 + $0xd4] sm:$0xf]  ;;  %v1457_v21 = vld [vmem:[%s2168_s2 + $0xd8] sm:$0xf0]  ;;  %v1399_v22 = vld [vmem:[%s2168_s2 + $0x60] sm:$0xf]  ;;  %v1396_v27 = vor.u32 %v1543_v18, %v1393_v19 }
   0xb   :  { %v1546_v23 = vld [vmem:[%s2168_s2 + $0x64] sm:$0xf0]  ;;  %267 = vmatpush.bf16.msra.mxu0 %v1408_v16  ;;  %v1463_v25 = vld [vmem:[%s2168_s2 + $0xe0] sm:$0xf]  ;;  %v1541_v29 = vld [vmem:[%s2168_s2 + $0x44] sm:$0xf]  ;;  %v1460_v31 = vor.u32 %v1559_v20, %v1457_v21 }
   0xc   :  { %286 = vmatpush.bf16.msra.mxu1 %v1472_v17  ;;  %v1400_v24 = vor.u32 %v1546_v23, %v1399_v22  ;;  %v1562_v26 = vld [vmem:[%s2168_s2 + $0xe4] sm:$0xf0]  ;;  %306 = vmatpush.bf16.msra.mxu2 %v1404_v11  ;;  %v1385_v30 = vld [vmem:[%s2168_s2 + $0x48] sm:$0xf0]  ;;  %v1391_v32 = vld [vmem:[%s2168_s2 + $0x50] sm:$0xf] }
   0xd   :  { %v1464_v28 = vor.u32 %v1562_v26, %v1463_v25  ;;  %325 = vmatpush.bf16.msra.mxu3 %v1468_v15  ;;  %v1544_v33 = vld [vmem:[%s2168_s2 + $0x54] sm:$0xf0]  ;;  %v1455_v34 = vld [vmem:[%s2168_s2 + $0xd0] sm:$0xf]  ;;  %v1557_v35 = vld [vmem:[%s2168_s2 + $0xc4] sm:$0xf]  ;;  %v1388_v41 = vor.u32 %v1541_v29, %v1385_v30 }
   0xe   :  { %v1449_v36 = vld [vmem:[%s2168_s2 + $0xc8] sm:$0xf0]  ;;  %v1560_v37 = vld [vmem:[%s2168_s2 + $0xd4] sm:$0xf0]  ;;  %v1392_v38 = vor.u32 %v1544_v33, %v1391_v32  ;;  %v1383_v40 = vld [vmem:[%s2168_s2 + $0x40] sm:$0xf] }
   0xf   :  { %268 = vmatpush.bf16.msra.mxu0 %v1400_v24  ;;  %v1456_v39 = vor.u32 %v1560_v37, %v1455_v34  ;;  %v1542_v42 = vld [vmem:[%s2168_s2 + $0x44] sm:$0xf0]  ;;  %v1447_v43 = vld [vmem:[%s2168_s2 + $0xc0] sm:$0xf]  ;;  %v1452_v45 = vor.u32 %v1557_v35, %v1449_v36  ;;  %v1539_v46 = vld [vmem:[%s2168_s2 + $0x34] sm:$0xf] }
  0x10   :  { %287 = vmatpush.bf16.msra.mxu1 %v1464_v28  ;;  %307 = vmatpush.bf16.msra.mxu2 %v1396_v27  ;;  %v1558_v44 = vld [vmem:[%s2168_s2 + $0xc4] sm:$0xf0]  ;;  %v1377_v47 = vld [vmem:[%s2168_s2 + $0x38] sm:$0xf0]  ;;  %v1555_v48 = vld [vmem:[%s2168_s2 + $0xb4] sm:$0xf]  ;;  %v1384_v50 = vor.u32 %v1542_v42, %v1383_v40 }
  0x11   :  { %326 = vmatpush.bf16.msra.mxu3 %v1460_v31  ;;  %v1441_v49 = vld [vmem:[%s2168_s2 + $0xb8] sm:$0xf0]  ;;  %v1448_v51 = vor.u32 %v1558_v44, %v1447_v43  ;;  %v1375_v52 = vld [vmem:[%s2168_s2 + $0x30] sm:$0xf]  ;;  %v1380_v53 = vor.u32 %v1539_v46, %v1377_v47  ;;  %v1540_v54 = vld [vmem:[%s2168_s2 + $0x34] sm:$0xf0] }
  0x12   :  { %v1439_v55 = vld [vmem:[%s2168_s2 + $0xb0] sm:$0xf]  ;;  %v1556_v56 = vld [vmem:[%s2168_s2 + $0xb4] sm:$0xf0]  ;;  %v1444_v57 = vor.u32 %v1555_v48, %v1441_v49  ;;  %v1537_v58 = vld [vmem:[%s2168_s2 + $0x24] sm:$0xf]  ;;  %v1376_v62 = vor.u32 %v1540_v54, %v1375_v52 }
  0x13   :  { %269 = vmatpush.bf16.msra.mxu0 %v1392_v38  ;;  %v1369_v59 = vld [vmem:[%s2168_s2 + $0x28] sm:$0xf0]  ;;  %v1553_v60 = vld [vmem:[%s2168_s2 + $0xa4] sm:$0xf]  ;;  %v1440_v63 = vor.u32 %v1556_v56, %v1439_v55  ;;  %v1367_v0 = vld [vmem:[%s2168_s2 + $0x20] sm:$0xf] }
  0x14   :  { %288 = vmatpush.bf16.msra.mxu1 %v1456_v39  ;;  %308 = vmatpush.bf16.msra.mxu2 %v1388_v41  ;;  %v1433_v61 = vld [vmem:[%s2168_s2 + $0xa8] sm:$0xf0]  ;;  %v1372_v1 = vor.u32 %v1537_v58, %v1369_v59  ;;  %v1538_v2 = vld [vmem:[%s2168_s2 + $0x24] sm:$0xf0]  ;;  %v1431_v3 = vld [vmem:[%s2168_s2 + $0xa0] sm:$0xf] }
  0x15   :  { %327 = vmatpush.bf16.msra.mxu3 %v1452_v45  ;;  %v1554_v4 = vld [vmem:[%s2168_s2 + $0xa4] sm:$0xf0]  ;;  %v1436_v5 = vor.u32 %v1553_v60, %v1433_v61  ;;  %v1535_v6 = vld [vmem:[%s2168_s2 + $0x14] sm:$0xf]  ;;  %v1361_v7 = vld [vmem:[%s2168_s2 + $0x18] sm:$0xf0]  ;;  %v1368_v10 = vor.u32 %v1538_v2, %v1367_v0 }
  0x16   :  { %v1551_v8 = vld [vmem:[%s2168_s2 + $0x94] sm:$0xf]  ;;  %v1425_v9 = vld [vmem:[%s2168_s2 + $0x98] sm:$0xf0]  ;;  %v1432_v11 = vor.u32 %v1554_v4, %v1431_v3  ;;  %v1359_v12 = vld [vmem:[%s2168_s2 + $0x10] sm:$0xf]  ;;  %v1364_v13 = vor.u32 %v1535_v6, %v1361_v7 }
  0x17   :  { %270 = vmatpush.bf16.msra.mxu0 %v1384_v50  ;;  %v1536_v14 = vld [vmem:[%s2168_s2 + $0x14] sm:$0xf0]  ;;  %v1423_v15 = vld [vmem:[%s2168_s2 + $0x90] sm:$0xf]  ;;  %v1428_v17 = vor.u32 %v1551_v8, %v1425_v9  ;;  %v1533_v18 = vld [vmem:[%s2168_s2 + $0x4] sm:$0xf] }
  0x18   :  { %289 = vmatpush.bf16.msra.mxu1 %v1448_v51  ;;  %309 = vmatpush.bf16.msra.mxu2 %v1380_v53  ;;  %v1552_v16 = vld [vmem:[%s2168_s2 + $0x94] sm:$0xf0]  ;;  %v1353_v19 = vld [vmem:[%s2168_s2 + $0x8] sm:$0xf0]  ;;  %v1549_v20 = vld [vmem:[%s2168_s2 + $0x84] sm:$0xf]  ;;  %v1360_v22 = vor.u32 %v1536_v14, %v1359_v12 }
  0x19   :  { %328 = vmatpush.bf16.msra.mxu3 %v1444_v57  ;;  %v1417_v21 = vld [vmem:[%s2168_s2 + $0x88] sm:$0xf0]  ;;  %v1424_v23 = vor.u32 %v1552_v16, %v1423_v15  ;;  %v1335_v24 = vld [vmem:[%s2166_s0] sm:$0xf]  ;;  %v1530_v25 = vld [vmem:[%s2166_s0 + $0x4] sm:$0xf0]  ;;  %v1356_v26 = vor.u32 %v1533_v18, %v1353_v19 }
  0x1a   :  { %v1529_v27 = vld [vmem:[%s2166_s0 + $0x4] sm:$0xf]  ;;  %v1351_v28 = vld [vmem:[%s2168_s2] sm:$0xf]  ;;  %v1534_v29 = vld [vmem:[%s2168_s2 + $0x4] sm:$0xf0]  ;;  %v1420_v30 = vor.u32 %v1549_v20, %v1417_v21  ;;  %v1336_v34 = vor.u32 %v1530_v25, %v1335_v24 }
  0x1b   :  { %271 = vmatpush.bf16.msra.mxu0 %v1376_v62  ;;  %v1337_v31 = vld [vmem:[%s2166_s0 + $0x8] sm:$0xf0]  ;;  %v1415_v32 = vld [vmem:[%s2168_s2 + $0x80] sm:$0xf]  ;;  %v1550_v33 = vld [vmem:[%s2168_s2 + $0x84] sm:$0xf0]  ;;  %v1352_v35 = vor.u32 %v1534_v29, %v1351_v28 }
  0x1c   :  { %290 = vmatpush.bf16.msra.mxu1 %v1440_v63  ;;  %310 = vmatpush.bf16.msra.mxu2 %v1372_v1  ;;  %v1340_v36 = vor.u32 %v1529_v27, %v1337_v31  ;;  %v1416_v37 = vor.u32 %v1550_v33, %v1415_v32  ;;  %v1343_v38 = vld [vmem:[%s2166_s0 + $0x10] sm:$0xf]  ;;  %v1532_v39 = vld [vmem:[%s2166_s0 + $0x14] sm:$0xf0]  ;;  %v1531_v40 = vld [vmem:[%s2166_s0 + $0x14] sm:$0xf] }
  0x1d   :  { %329 = vmatpush.bf16.msra.mxu3 %v1436_v5  ;;  %v1345_v41 = vld [vmem:[%s2166_s0 + $0x18] sm:$0xf0]  ;;  %v1344_v42 = vor.u32 %v1532_v39, %v1343_v38  ;;  %v499_v44 = vld [vmem:[#allocation2 + $0x168] sm:$0xff]  ;;  %v496_v45 = vld [vmem:[#allocation2 + $0x150] sm:$0xff]  ;;  %vm351_vm0 = vcmask 261120  }
  0x1e   :  { %v1348_v43 = vor.u32 %v1531_v40, %v1345_v41  ;;  %v493_v46 = vld [vmem:[#allocation2 + $0x138] sm:$0xff]  ;;  %v490_v47 = vld [vmem:[#allocation2 + $0x120] sm:$0xff]  ;;  %v487_v48 = vld [vmem:[#allocation2 + $0x108] sm:$0xff] }
  0x1f   :  { %272 = vmatpush.bf16.msra.mxu0 %v1368_v10  ;;  %v484_v49 = vld [vmem:[#allocation2 + $0xf0] sm:$0xff]  ;;  %v481_v50 = vld [vmem:[#allocation2 + $0xd8] sm:$0xff]  ;;  %v478_v51 = vld [vmem:[#allocation2 + $0xc0] sm:$0xff] }
  0x20   :  { %291 = vmatpush.bf16.msra.mxu1 %v1432_v11  ;;  %311 = vmatpush.bf16.msra.mxu2 %v1364_v13  ;;  %v475_v52 = vld [vmem:[#allocation2 + $0xa8] sm:$0xff]  ;;  %v472_v53 = vld [vmem:[#allocation2 + $0x90] sm:$0xff]  ;;  %v469_v54 = vld [vmem:[#allocation2 + $0x78] sm:$0xff] }
  0x21   :  { %330 = vmatpush.bf16.msra.mxu3 %v1428_v17  ;;  %v466_v55 = vld [vmem:[#allocation2 + $0x60] sm:$0xff]  ;;  %v463_v56 = vld [vmem:[#allocation2 + $0x48] sm:$0xff]  ;;  %v460_v58 = vld [vmem:[#allocation2 + $0x30] sm:$0xff] }
  0x22   :  { %v457_v60 = vld [vmem:[#allocation2 + $0x18] sm:$0xff]  ;;  %v454_v63 = vld [vmem:[#allocation2] sm:$0xff]  ;;  %v1892_v5 = vld [vmem:[%s2167_s1 + $0x8] sm:$0xff] }
  0x23   :  { %273 = vmatpush.bf16.msra.mxu0 %v1360_v22  ;;  %v1886_v0 = vld [vmem:[%s2167_s1] sm:$0xff]  ;;  %v1898_v10 = vld [vmem:[%s2167_s1 + $0x10] sm:$0xff]  ;;  %v1904_v19 = vld [vmem:[%s2167_s1 + $0x18] sm:$0xff] }
  0x24   :  { %292 = vmatpush.bf16.msra.mxu1 %v1424_v23  ;;  %312 = vmatpush.bf16.msra.mxu2 %v1356_v26  ;;  %v343_v22 = vld [vmem:[%s2170_s4] sm:$0xff]  ;;  %v501_v26 = vld [vmem:[#allocation2 + $0x178] sm:$0xff]  ;;  %v495_v28 = vld [vmem:[#allocation2 + $0x148] sm:$0xff] }
  0x25   :  { %331 = vmatpush.bf16.msra.mxu3 %v1420_v30  ;;  %v347_v25 = vld [vmem:[%s2171_s5] sm:$0xff]  ;;  %v344_v29 = vld [vmem:[%s2170_s4 + $0x8] sm:$0xff]  ;;  %v492_v30 = vld [vmem:[#allocation2 + $0x130] sm:$0xff] }
  0x26   :  { %v498_v27 = vld [vmem:[#allocation2 + $0x160] sm:$0xff]  ;;  %v348_v31 = vld [vmem:[%s2171_s5 + $0x8] sm:$0xff]  ;;  %v489_v32 = vld [vmem:[#allocation2 + $0x118] sm:$0xff] }
  0x27   :  { %313 = vmatmul.bf16.vlgmr.msra.gmra.mxu2 %v1336_v34  ;;  %274 = vmatpush.bf16.msra.mxu0 %v1352_v35  ;;  %v486_v33 = vld [vmem:[#allocation2 + $0x100] sm:$0xff]  ;;  %v345_v35 = vld [vmem:[%s2170_s4 + $0x10] sm:$0xff]  ;;  %v477_v38 = vld [vmem:[#allocation2 + $0xb8] sm:$0xff] }
  0x28   :  { %332 = vmatmul.bf16.vlgmr.msra.gmra.mxu3 %v1340_v36  ;;  %293 = vmatpush.bf16.msra.mxu1 %v1416_v37  ;;  %v349_v37 = vld [vmem:[%s2171_s5 + $0x10] sm:$0xff]  ;;  %v474_v39 = vld [vmem:[#allocation2 + $0xa0] sm:$0xff]  ;;  %v471_v40 = vld [vmem:[#allocation2 + $0x88] sm:$0xff] }
  0x29   :  { %502 = vmatpush.msrb.mxu2 %v499_v44  ;;  %v346_v41 = vld [vmem:[%s2170_s4 + $0x18] sm:$0xff] }
  0x2a   :  { %275 = vmatmul.bf16.vlgmr.msra.gmra.mxu0 %v1336_v34  ;;  %v483_v34 = vld [vmem:[#allocation2 + $0xe8] sm:$0xff]  ;;  %v465_v44 = vld [vmem:[#allocation2 + $0x58] sm:$0xff] }
  0x2b   :  { %294 = vmatmul.bf16.vlgmr.msra.gmra.mxu1 %v1340_v36  ;;  %503 = vmatpush.msrb.mxu2 %v496_v45  ;;  %v480_v36 = vld [vmem:[#allocation2 + $0xd0] sm:$0xff]  ;;  %v462_v45 = vld [vmem:[#allocation2 + $0x40] sm:$0xff] }
  0x2d   :  { %504 = vmatpush.msrb.mxu2 %v493_v46  ;;  %v459_v46 = vld [vmem:[#allocation2 + $0x28] sm:$0xff] }
  0x2f   :  { %505 = vmatpush.msrb.mxu2 %v490_v47  ;;  %v456_v47 = vld [vmem:[#allocation2 + $0x10] sm:$0xff] }
  0x31   :  { %506 = vmatpush.msrb.mxu2 %v487_v48 }
  0x33   :  { %507 = vmatpush.msrb.mxu2 %v484_v49 }
  0x35   :  { %508 = vmatpush.msrb.mxu2 %v481_v50 }
  0x37   :  { %318 = vmatmul.bf16.gmra.mxu2 %v1344_v42 }
  0x38   :  { %337 = vmatmul.bf16.gmra.mxu3 %v1348_v43  ;;  %509 = vmatpush.msrb.mxu2 %v478_v51  ;;  %v500_v51 = vld [vmem:[#allocation2 + $0x170] sm:$0xff] }
  0x39   :  { %531 = vmatpush.msrb.mxu3 %v500_v51  ;;  %v714_v51 = vld [vmem:[#allocation2 + $0x250] sm:$0xff] }
  0x3a   :  { %280 = vmatmul.bf16.gmra.mxu0 %v1344_v42  ;;  %510 = vmatpush.msrb.mxu2 %v475_v52  ;;  %v468_v42 = vld [vmem:[#allocation2 + $0x70] sm:$0xff] }
  0x3b   :  { %299 = vmatmul.bf16.gmra.mxu1 %v1348_v43  ;;  %v350_v43 = vld [vmem:[%s2171_s5 + $0x18] sm:$0xff] }
  0x3c   :  { %511 = vmatpush.msrb.mxu2 %v472_v53 }
  0x3e   :  { %512 = vmatpush.msrb.mxu2 %v469_v54 }
  0x40   :  { %513 = vmatpush.msrb.mxu2 %v466_v55  ;;  %v497_v55 = vld [vmem:[#allocation2 + $0x158] sm:$0xff] }
  0x41   :  { %532 = vmatpush.msrb.mxu3 %v497_v55  ;;  %v706_v55 = vld [vmem:[#allocation2 + $0x210] sm:$0xff] }
  0x42   :  { %514 = vmatpush.msrb.mxu2 %v463_v56  ;;  %v494_v56 = vld [vmem:[#allocation2 + $0x140] sm:$0xff] }
  0x43   :  { %533 = vmatpush.msrb.mxu3 %v494_v56  ;;  %v707_v56 = vld [vmem:[#allocation2 + $0x218] sm:$0xff] }
  0x44   :  { %515 = vmatpush.msrb.mxu2 %v460_v58  ;;  %v491_v58 = vld [vmem:[#allocation2 + $0x128] sm:$0xff] }
  0x45   :  { %534 = vmatpush.msrb.mxu3 %v491_v58  ;;  %v708_v58 = vld [vmem:[#allocation2 + $0x220] sm:$0xff] }
  0x46   :  { %516 = vmatpush.msrb.mxu2 %v457_v60 }
  0x48   :  { %517 = vmatpush.msrb.mxu2 %v454_v63  ;;  %v482_v63 = vld [vmem:[#allocation2 + $0xe0] sm:$0xff] }
  0x49   :  { %518 = vmatmul.f32.vlgmr.msrb.gmra.mxu2 %v1886_v0 }
  0x51   :  { %521 = vmatmul.f32.gmra.mxu2 %v1892_v5 }
  0x59   :  { %524 = vmatmul.f32.gmra.mxu2 %v1898_v10 }
  0x61   :  { %527 = vmatmul.f32.gmra.mxu2 %v1904_v19 }
  0xa7   :  { %v276_v57 = vpop.f32.mrf.mxu0 }
  0xa8   :  { %v295_v59 = vpop.f32.mrf.mxu1 }
  0xa9   :  { %v296_v20 = vadd.f32 %v295_v59, %v276_v57  ;;  %v488_v59 = vld [vmem:[#allocation2 + $0x110] sm:$0xff] }
  0xaa   :  { %v314_v61 = vpop.f32.mrf.mxu2  ;;  %535 = vmatpush.msrb.mxu3 %v488_v59  ;;  %v703_v59 = vld [vmem:[#allocation2 + $0x1f8] sm:$0xff] }
  0xab   :  { %v333_v62 = vpop.f32.mrf.mxu3 }
  0xac   :  { %v334_v24 = vadd.f32 %v333_v62, %v314_v61  ;;  %v485_v62 = vld [vmem:[#allocation2 + $0xf8] sm:$0xff] }
  0xad   :  { %536 = vmatpush.msrb.mxu3 %v485_v62  ;;  %v2000_v62 = vld [vmem:[%s2173_s7 + $0x10] sm:$0xff] }
  0xaf   :  { %v278_v1 = vpop.f32.mrf.mxu0  ;;  %537 = vmatpush.msrb.mxu3 %v482_v63  ;;  %v2007_v63 = vld [vmem:[%s2173_s7 + $0x18] sm:$0xff] }
  0xb0   :  { %v297_v2 = vpop.f32.mrf.mxu1 }
  0xb1   :  { %v298_v17 = vadd.f32 %v297_v2, %v278_v1  ;;  %v479_v2 = vld [vmem:[#allocation2 + $0xc8] sm:$0xff] }
  0xb2   :  { %v316_v3 = vpop.f32.mrf.mxu2  ;;  %538 = vmatpush.msrb.mxu3 %v479_v2  ;;  %v700_v2 = vld [vmem:[#allocation2 + $0x1e0] sm:$0xff] }
  0xb3   :  { %v335_v4 = vpop.f32.mrf.mxu3 }
  0xb4   :  { %v336_v23 = vadd.f32 %v335_v4, %v316_v3  ;;  %v476_v3 = vld [vmem:[#allocation2 + $0xb0] sm:$0xff] }
  0xb5   :  { %539 = vmatpush.msrb.mxu3 %v476_v3  ;;  %v701_v3 = vld [vmem:[#allocation2 + $0x1e8] sm:$0xff] }
  0xb7   :  { %v281_v6 = vpop.f32.mrf.mxu0 }
  0xb8   :  { %v300_v7 = vpop.f32.mrf.mxu1 }
  0xb9   :  { %v301_v13 = vadd.f32 %v300_v7, %v281_v6  ;;  %v473_v7 = vld [vmem:[#allocation2 + $0x98] sm:$0xff] }
  0xba   :  { %v319_v8 = vpop.f32.mrf.mxu2  ;;  %540 = vmatpush.msrb.mxu3 %v473_v7  ;;  %v698_v7 = vld [vmem:[#allocation2 + $0x1d0] sm:$0xff] }
  0xbb   :  { %v338_v9 = vpop.f32.mrf.mxu3 }
  0xbc   :  { %v339_v21 = vadd.f32 %v338_v9, %v319_v8  ;;  %v470_v8 = vld [vmem:[#allocation2 + $0x80] sm:$0xff] }
  0xbd   :  { %541 = vmatpush.msrb.mxu3 %v470_v8  ;;  %v699_v8 = vld [vmem:[#allocation2 + $0x1d8] sm:$0xff] }
  0xbf   :  { %v283_v11 = vpop.f32.mrf.mxu0 }
  0xc0   :  { %v302_v12 = vpop.f32.mrf.mxu1 }
  0xc1   :  { %v303_v14 = vadd.f32 %v302_v12, %v283_v11  ;;  %v467_v11 = vld [vmem:[#allocation2 + $0x68] sm:$0xff]  ;;  %v464_v12 = vld [vmem:[#allocation2 + $0x50] sm:$0xff] }
  0xc2   :  { %v321_v15 = vpop.f32.mrf.mxu2  ;;  %542 = vmatpush.msrb.mxu3 %v467_v11  ;;  %v694_v11 = vld [vmem:[#allocation2 + $0x1b0] sm:$0xff] }
  0xc3   :  { %v340_v16 = vpop.f32.mrf.mxu3  ;;  %417 = vmatpush.msrb.mxu1 %v303_v14  ;;  %v461_v14 = vld [vmem:[#allocation2 + $0x38] sm:$0xff] }
  0xc4   :  { %v341_v18 = vadd.f32 %v340_v16, %v321_v15  ;;  %543 = vmatpush.msrb.mxu3 %v464_v12  ;;  %v458_v15 = vld [vmem:[#allocation2 + $0x20] sm:$0xff]  ;;  %v455_v16 = vld [vmem:[#allocation2 + $0x8] sm:$0xff]  ;;  %v695_v12 = vld [vmem:[#allocation2 + $0x1b8] sm:$0xff] }
  0xc5   :  { %418 = vmatpush.msrb.mxu1 %v301_v13 }
  0xc6   :  { %376 = vmatpush.msrb.mxu0 %v341_v18  ;;  %544 = vmatpush.msrb.mxu3 %v461_v14  ;;  %v1955_v18 = vld [vmem:[%s2172_s6] sm:$0xff] }
  0xc7   :  { %419 = vmatpush.msrb.mxu1 %v298_v17  ;;  %v696_v14 = vld [vmem:[#allocation2 + $0x1c0] sm:$0xff] }
  0xc8   :  { %377 = vmatpush.msrb.mxu0 %v339_v21  ;;  %545 = vmatpush.msrb.mxu3 %v458_v15  ;;  %v1963_v21 = vld [vmem:[%s2172_s6 + $0x8] sm:$0xff]  ;;  %v691_v15 = vld [vmem:[#allocation2 + $0x198] sm:$0xff] }
  0xc9   :  { %420 = vmatpush.msrb.mxu1 %v296_v20 }
  0xca   :  { %378 = vmatpush.msrb.mxu0 %v336_v23  ;;  %1481 = vmatmul.msk.f32.vlgmr.msrb.gmra.mxu1 %vm351_vm0, %v343_v22  ;;  %v1971_v23 = vld [vmem:[%s2172_s6 + $0x10] sm:$0xff] }
  0xcb   :  { %546 = vmatpush.msrb.mxu3 %v455_v16  ;;  %v692_v16 = vld [vmem:[#allocation2 + $0x1a0] sm:$0xff] }
  0xcc   :  { %379 = vmatpush.msrb.mxu0 %v334_v24  ;;  %v519_v48 = vpop.f32.mrf.mxu2  ;;  %547 = vmatmul.f32.vlgmr.msrb.gmra.mxu3 %v1886_v0 }
  0xcd   :  { %1477 = vmatmul.msk.f32.vlgmr.msrb.gmra.mxu0 %vm351_vm0, %v347_v25  ;;  %v1979_v25 = vld [vmem:[%s2172_s6 + $0x18] sm:$0xff] }
  0xce   :  { %560 = vmatpush.msra.mxu0 %v501_v26  ;;  %v733_v26 = vld [vmem:[#allocation2 + $0x2e8] sm:$0xff] }
  0xcf   :  { %736 = vmatpush.msra.mxu3 %v733_v26 }
  0xd0   :  { %561 = vmatpush.msra.mxu0 %v498_v27  ;;  %v734_v27 = vld [vmem:[#allocation2 + $0x2f0] sm:$0xff] }
  0xd2   :  { %562 = vmatpush.msra.mxu0 %v495_v28  ;;  %1482 = vmatmul.msk.f32.gmra.mxu1 %vm351_vm0, %v344_v29  ;;  %v735_v28 = vld [vmem:[#allocation2 + $0x2f8] sm:$0xff]  ;;  %v730_v29 = vld [vmem:[#allocation2 + $0x2d0] sm:$0xff] }
  0xd3   :  { %737 = vmatpush.msra.mxu3 %v730_v29 }
  0xd4   :  { %563 = vmatpush.msra.mxu0 %v492_v30  ;;  %v522_v49 = vpop.f32.mrf.mxu2  ;;  %550 = vmatmul.f32.gmra.mxu3 %v1892_v5  ;;  %v731_v30 = vld [vmem:[#allocation2 + $0x2d8] sm:$0xff] }
  0xd5   :  { %1478 = vmatmul.msk.f32.gmra.mxu0 %vm351_vm0, %v348_v31  ;;  %v732_v31 = vld [vmem:[#allocation2 + $0x2e0] sm:$0xff] }
  0xd6   :  { %564 = vmatpush.msra.mxu0 %v489_v32  ;;  %v727_v32 = vld [vmem:[#allocation2 + $0x2b8] sm:$0xff] }
  0xd7   :  { %738 = vmatpush.msra.mxu3 %v727_v32 }
  0xd8   :  { %565 = vmatpush.msra.mxu0 %v486_v33  ;;  %v728_v33 = vld [vmem:[#allocation2 + $0x2c0] sm:$0xff] }
  0xda   :  { %566 = vmatpush.msra.mxu0 %v483_v34  ;;  %1483 = vmatmul.msk.f32.gmra.mxu1 %vm351_vm0, %v345_v35  ;;  %v729_v34 = vld [vmem:[#allocation2 + $0x2c8] sm:$0xff]  ;;  %v1986_v35 = vld [vmem:[%s2173_s7] sm:$0xff] }
  0xdc   :  { %567 = vmatpush.msra.mxu0 %v480_v36  ;;  %v525_v50 = vpop.f32.mrf.mxu2  ;;  %553 = vmatmul.f32.gmra.mxu3 %v1898_v10  ;;  %v724_v36 = vld [vmem:[#allocation2 + $0x2a0] sm:$0xff] }
  0xdd   :  { %1479 = vmatmul.msk.f32.gmra.mxu0 %vm351_vm0, %v349_v37  ;;  %v725_v37 = vld [vmem:[#allocation2 + $0x2a8] sm:$0xff]  ;;  %739 = vmatpush.msra.mxu3 %v724_v36 }
  0xde   :  { %568 = vmatpush.msra.mxu0 %v477_v38  ;;  %v726_v38 = vld [vmem:[#allocation2 + $0x2b0] sm:$0xff] }
  0xe0   :  { %569 = vmatpush.msra.mxu0 %v474_v39  ;;  %v721_v39 = vld [vmem:[#allocation2 + $0x288] sm:$0xff] }
  0xe1   :  { %740 = vmatpush.msra.mxu3 %v721_v39 }
  0xe2   :  { %570 = vmatpush.msra.mxu0 %v471_v40  ;;  %1484 = vmatmul.msk.f32.gmra.mxu1 %vm351_vm0, %v346_v41  ;;  %v722_v40 = vld [vmem:[#allocation2 + $0x290] sm:$0xff]  ;;  %v723_v41 = vld [vmem:[#allocation2 + $0x298] sm:$0xff] }
  0xe4   :  { %571 = vmatpush.msra.mxu0 %v468_v42  ;;  %v528_v53 = vpop.f32.mrf.mxu2  ;;  %556 = vmatmul.f32.gmra.mxu3 %v1904_v19  ;;  %v718_v42 = vld [vmem:[#allocation2 + $0x270] sm:$0xff] }
  0xe5   :  { %1480 = vmatmul.msk.f32.gmra.mxu0 %vm351_vm0, %v350_v43  ;;  %613 = vmatpush.msra.mxu1 %v528_v53  ;;  %v719_v43 = vld [vmem:[#allocation2 + $0x278] sm:$0xff]  ;;  %v710_v53 = vld [vmem:[#allocation2 + $0x230] sm:$0xff] }
  0xe6   :  { %572 = vmatpush.msra.mxu0 %v465_v44  ;;  %v720_v44 = vld [vmem:[#allocation2 + $0x280] sm:$0xff]  ;;  %741 = vmatpush.msra.mxu3 %v718_v42 }
  0xe7   :  { %614 = vmatpush.msra.mxu1 %v525_v50  ;;  %v713_v50 = vld [vmem:[#allocation2 + $0x248] sm:$0xff] }
  0xe8   :  { %573 = vmatpush.msra.mxu0 %v462_v45  ;;  %v715_v45 = vld [vmem:[#allocation2 + $0x258] sm:$0xff] }
  0xe9   :  { %615 = vmatpush.msra.mxu1 %v522_v49  ;;  %v712_v49 = vld [vmem:[#allocation2 + $0x240] sm:$0xff]  ;;  %742 = vmatpush.msra.mxu3 %v715_v45 }
  0xea   :  { %574 = vmatpush.msra.mxu0 %v459_v46  ;;  %v716_v46 = vld [vmem:[#allocation2 + $0x260] sm:$0xff] }
  0xeb   :  { %616 = vmatpush.msra.mxu1 %v519_v48  ;;  %v1993_v48 = vld [vmem:[%s2173_s7 + $0x8] sm:$0xff]  ;;  %743 = vmatpush.msra.mxu3 %v712_v49  ;;  %v677_v49 = vld [vmem:[%s2175_s9 + $0x10] sm:$0xff] }
  0xec   :  { %575 = vmatpush.msra.mxu0 %v456_v47  ;;  %1485 = vmatmul.msk.f32.vlgmr.msra.gmra.mxu1 %vm351_vm0, %v1955_v18  ;;  %v717_v47 = vld [vmem:[#allocation2 + $0x268] sm:$0xff] }
  0xed   :  { %576 = vmatmul.f32.vlgmr.msra.gmra.mxu0 %v1886_v0  ;;  %794 = vmatpush.msrb.mxu1 %v735_v28 }
  0xee   :  { %765 = vmatpush.msrb.mxu0 %v734_v27 }
  0xef   :  { %795 = vmatpush.msrb.mxu1 %v732_v31 }
  0xf0   :  { %766 = vmatpush.msrb.mxu0 %v731_v30 }
  0xf1   :  { %796 = vmatpush.msrb.mxu1 %v729_v34 }
  0xf2   :  { %767 = vmatpush.msrb.mxu0 %v728_v33  ;;  %v675_v33 = vld [vmem:[%s2175_s9] sm:$0xff] }
  0xf3   :  { %797 = vmatpush.msrb.mxu1 %v726_v38 }
  0xf4   :  { %1486 = vmatmul.msk.f32.gmra.mxu1 %vm351_vm0, %v1963_v21  ;;  %768 = vmatpush.msrb.mxu0 %v725_v37 }
  0xf5   :  { %579 = vmatmul.f32.gmra.mxu0 %v1892_v5  ;;  %798 = vmatpush.msrb.mxu1 %v723_v41  ;;  %v676_v41 = vld [vmem:[%s2175_s9 + $0x8] sm:$0xff] }
  0xf6   :  { %769 = vmatpush.msrb.mxu0 %v722_v40 }
  0xf7   :  { %799 = vmatpush.msrb.mxu1 %v720_v44 }
  0xf8   :  { %770 = vmatpush.msrb.mxu0 %v719_v43 }
  0xf9   :  { %800 = vmatpush.msrb.mxu1 %v717_v47 }
  0xfa   :  { %771 = vmatpush.msrb.mxu0 %v716_v46 }
  0xfb   :  { %801 = vmatpush.msrb.mxu1 %v714_v51 }
  0xfc   :  { %1487 = vmatmul.msk.f32.gmra.mxu1 %vm351_vm0, %v1971_v23  ;;  %772 = vmatpush.msrb.mxu0 %v713_v50 }
  0xfd   :  { %582 = vmatmul.f32.gmra.mxu0 %v1898_v10 }
  0xfe   :  { %773 = vmatpush.msrb.mxu0 %v710_v53 }
 0x100   :  { %774 = vmatpush.msrb.mxu0 %v707_v56 }
 0x104   :  { %1488 = vmatmul.msk.f32.gmra.mxu1 %vm351_vm0, %v1979_v25 }
 0x105   :  { %585 = vmatmul.f32.gmra.mxu0 %v1904_v19 }
 0x147   :  { %v422_v52 = vpop.f32.mrf.mxu1 }
 0x14a   :  { %v381_v54 = vpop.f32.mrf.mxu0 }
 0x14b   :  { %v1943_v57 = vadd.f32 %v422_v52, %v381_v54  ;;  %v709_v52 = vld [vmem:[#allocation2 + $0x228] sm:$0xff]  ;;  %v711_v54 = vld [vmem:[#allocation2 + $0x238] sm:$0xff] }
 0x14c   :  { %744 = vmatpush.msra.mxu3 %v709_v52  ;;  %802 = vmatpush.msrb.mxu1 %v711_v54 }
 0x14e   :  { %745 = vmatpush.msra.mxu3 %v706_v55  ;;  %803 = vmatpush.msrb.mxu1 %v708_v58  ;;  %v678_v58 = vld [vmem:[%s2175_s9 + $0x18] sm:$0xff] }
 0x14f   :  { %v425_v60 = vpop.f32.mrf.mxu1  ;;  %v548_v28 = vpop.f32.mrf.mxu3 }
 0x150   :  { %746 = vmatpush.msra.mxu3 %v703_v59 }
 0x152   :  { %v384_v61 = vpop.f32.mrf.mxu0  ;;  %747 = vmatpush.msra.mxu3 %v700_v2 }
 0x153   :  { %v1945_v1 = vadd.f32 %v425_v60, %v384_v61  ;;  %v704_v60 = vld [vmem:[#allocation2 + $0x200] sm:$0xff]  ;;  %v705_v61 = vld [vmem:[#allocation2 + $0x208] sm:$0xff] }
 0x154   :  { %775 = vmatpush.msrb.mxu0 %v704_v60  ;;  %804 = vmatpush.msrb.mxu1 %v705_v61 }
 0x156   :  { %776 = vmatpush.msrb.mxu0 %v701_v3 }
 0x157   :  { %v428_v4 = vpop.f32.mrf.mxu1  ;;  %v551_v31 = vpop.f32.mrf.mxu3 }
 0x158   :  { %777 = vmatpush.msrb.mxu0 %v698_v7 }
 0x15a   :  { %v387_v6 = vpop.f32.mrf.mxu0  ;;  %778 = vmatpush.msrb.mxu0 %v695_v12 }
 0x15b   :  { %v1947_v9 = vadd.f32 %v428_v4, %v387_v6  ;;  %v702_v4 = vld [vmem:[#allocation2 + $0x1f0] sm:$0xff]  ;;  %v697_v6 = vld [vmem:[#allocation2 + $0x1c8] sm:$0xff] }
 0x15c   :  { %805 = vmatpush.msrb.mxu1 %v702_v4  ;;  %748 = vmatpush.msra.mxu3 %v697_v6 }
 0x15d   :  { %779 = vmatpush.msrb.mxu0 %v692_v16  ;;  %v945_v16 = vld [vmem:[#allocation2 + $0x450] sm:$0xff] }
 0x15e   :  { %806 = vmatpush.msrb.mxu1 %v699_v8  ;;  %749 = vmatpush.msra.mxu3 %v694_v11 }
 0x15f   :  { %v2011_v26 = vpop.f32.mrf.mxu1  ;;  %v554_v42 = vpop.f32.mrf.mxu3 }
 0x160   :  { %807 = vmatpush.msrb.mxu1 %v696_v14  ;;  %750 = vmatpush.msra.mxu3 %v691_v15  ;;  %v948_v14 = vld [vmem:[#allocation2 + $0x468] sm:$0xff]  ;;  %v949_v15 = vld [vmem:[#allocation2 + $0x470] sm:$0xff] }
 0x162   :  { %v1949_v13 = vpop.f32.mrf.mxu0 }
 0x167   :  { %v557_v51 = vpop.f32.mrf.mxu3 }
 0x169   :  { %v618_v27 = vpop.f32.mrf.mxu1 }
 0x16a   :  { %v577_v17 = vpop.f32.mrf.mxu0  ;;  %v619_v29 = vadd.f32 %v618_v27, %v548_v28  ;;  %v950_v27 = vld [vmem:[#allocation2 + $0x478] sm:$0xff]  ;;  %v940_v28 = vld [vmem:[#allocation2 + $0x428] sm:$0xff] }
 0x171   :  { %v621_v30 = vpop.f32.mrf.mxu1 }
 0x172   :  { %v580_v20 = vpop.f32.mrf.mxu0  ;;  %v622_v38 = vadd.f32 %v621_v30, %v551_v31  ;;  %v947_v30 = vld [vmem:[#allocation2 + $0x460] sm:$0xff]  ;;  %v937_v31 = vld [vmem:[#allocation2 + $0x410] sm:$0xff] }
 0x179   :  { %v624_v39 = vpop.f32.mrf.mxu1 }
 0x17a   :  { %v583_v22 = vpop.f32.mrf.mxu0  ;;  %v625_v46 = vadd.f32 %v624_v39, %v554_v42  ;;  %v938_v39 = vld [vmem:[#allocation2 + $0x418] sm:$0xff]  ;;  %v935_v42 = vld [vmem:[#allocation2 + $0x400] sm:$0xff] }
 0x181   :  { %v627_v52 = vpop.f32.mrf.mxu1 }
 0x182   :  { %v586_v24 = vpop.f32.mrf.mxu0  ;;  %v628_v55 = vadd.f32 %v627_v52, %v557_v51  ;;  %v923_v51 = vld [vmem:[#allocation2 + $0x3a0] sm:$0xff]  ;;  %v918_v52 = vld [vmem:[#allocation2 + $0x378] sm:$0xff] }
 0x183   :  { %654 = vmatpush.msra.mxu2 %v586_v24  ;;  %v690_v24 = vld [vmem:[#allocation2 + $0x190] sm:$0xff] }
 0x185   :  { %655 = vmatpush.msra.mxu2 %v583_v22  ;;  %v689_v22 = vld [vmem:[#allocation2 + $0x188] sm:$0xff] }
 0x186   :  { %780 = vmatpush.msrb.mxu0 %v689_v22  ;;  %v943_v22 = vld [vmem:[#allocation2 + $0x440] sm:$0xff] }
 0x187   :  { %656 = vmatpush.msra.mxu2 %v580_v20  ;;  %v688_v20 = vld [vmem:[#allocation2 + $0x180] sm:$0xff] }
 0x188   :  { %751 = vmatpush.msra.mxu3 %v688_v20  ;;  %951 = vmatpush.msra.mxu0 %v948_v14  ;;  %v942_v20 = vld [vmem:[#allocation2 + $0x438] sm:$0xff]  ;;  %v905_v14 = vld [vmem:[#allocation2 + $0x310] sm:$0xff] }
 0x189   :  { %657 = vmatpush.msra.mxu2 %v577_v17  ;;  %v693_v17 = vld [vmem:[#allocation2 + $0x1a8] sm:$0xff] }
 0x18a   :  { %1489 = vmatmul.msk.f32.vlgmr.msra.gmra.mxu2 %vm351_vm0, %v1986_v35  ;;  %808 = vmatpush.msrb.mxu1 %v693_v17  ;;  %v946_v17 = vld [vmem:[#allocation2 + $0x458] sm:$0xff] }
 0x18b   :  { %952 = vmatpush.msra.mxu0 %v945_v16 }
 0x18c   :  { %809 = vmatpush.msrb.mxu1 %v690_v24  ;;  %v939_v24 = vld [vmem:[#allocation2 + $0x420] sm:$0xff] }
 0x18d   :  { %953 = vmatpush.msra.mxu0 %v942_v20 }
 0x18e   :  { %980 = vmatpush.msra.mxu1 %v949_v15 }
 0x18f   :  { %954 = vmatpush.msra.mxu0 %v939_v24 }
 0x190   :  { %981 = vmatpush.msra.mxu1 %v946_v17 }
 0x192   :  { %1490 = vmatmul.msk.f32.gmra.mxu2 %vm351_vm0, %v1993_v48  ;;  %982 = vmatpush.msra.mxu1 %v943_v22  ;;  %v1501_v22 = vld [vmem:[%s2175_s9 + $0x20] sm:$0xff] }
 0x194   :  { %983 = vmatpush.msra.mxu1 %v940_v28  ;;  %v434_v28 = vld [vmem:[%s2169_s3] sm:$0xff] }
 0x196   :  { %984 = vmatpush.msra.mxu1 %v937_v31  ;;  %v438_v31 = vadd.f32 %v434_v28, %v1943_v57  ;;  %v1151_v28 = vld [vmem:[#allocation2 + $0x5a8] sm:$0xff] }
 0x19a   :  { %1491 = vmatmul.msk.f32.gmra.mxu2 %vm351_vm0, %v2000_v62 }
 0x1a2   :  { %1492 = vmatmul.msk.f32.gmra.mxu2 %vm351_vm0, %v2007_v63 }
 0x20d   :  { %v659_v32 = vpop.f32.mrf.mxu2 }
 0x20e   :  { %v671_v34 = vadd.f32 %v659_v32, %v619_v29  ;;  %v936_v29 = vld [vmem:[#allocation2 + $0x408] sm:$0xff]  ;;  %v933_v32 = vld [vmem:[#allocation2 + $0x3f0] sm:$0xff] }
 0x20f   :  { %955 = vmatpush.msra.mxu0 %v936_v29 }
 0x210   :  { %v679_v36 = vadd.f32 %v675_v33, %v671_v34  ;;  %v944_v33 = vld [vmem:[#allocation2 + $0x448] sm:$0xff]  ;;  %v934_v34 = vld [vmem:[#allocation2 + $0x3f8] sm:$0xff] }
 0x211   :  { %956 = vmatpush.msra.mxu0 %v933_v32  ;;  %985 = vmatpush.msra.mxu1 %v934_v34 }
 0x212   :  { %v683_v37 = vmax.f32 %v679_v36, 0.0  ;;  %v930_v36 = vld [vmem:[#allocation2 + $0x3d8] sm:$0xff] }
 0x213   :  { %957 = vmatpush.msra.mxu0 %v930_v36 }
 0x214   :  { %752 = vmatmul.f32.vlgmr.msra.gmra.mxu3 %v683_v37  ;;  %781 = vmatmul.f32.vlgmr.msrb.gmra.mxu0 %v683_v37 }
 0x215   :  { %810 = vmatmul.f32.vlgmr.msrb.gmra.mxu1 %v683_v37  ;;  %v662_v40 = vpop.f32.mrf.mxu2  ;;  %v941_v37 = vld [vmem:[#allocation2 + $0x430] sm:$0xff] }
 0x216   :  { %v672_v43 = vadd.f32 %v662_v40, %v622_v38  ;;  %v931_v38 = vld [vmem:[#allocation2 + $0x3e0] sm:$0xff] }
 0x217   :  { %v927_v40 = vld [vmem:[#allocation2 + $0x3c0] sm:$0xff]  ;;  %986 = vmatpush.msra.mxu1 %v931_v38 }
 0x218   :  { %v680_v44 = vadd.f32 %v676_v41, %v672_v43  ;;  %v928_v41 = vld [vmem:[#allocation2 + $0x3c8] sm:$0xff]  ;;  %958 = vmatpush.msra.mxu0 %v927_v40 }
 0x219   :  { %v924_v43 = vld [vmem:[#allocation2 + $0x3a8] sm:$0xff]  ;;  %987 = vmatpush.msra.mxu1 %v928_v41 }
 0x21a   :  { %v684_v45 = vmax.f32 %v680_v44, 0.0  ;;  %v925_v44 = vld [vmem:[#allocation2 + $0x3b0] sm:$0xff]  ;;  %959 = vmatpush.msra.mxu0 %v924_v43 }
 0x21b   :  { %988 = vmatpush.msra.mxu1 %v925_v44 }
 0x21c   :  { %755 = vmatmul.f32.gmra.mxu3 %v684_v45  ;;  %784 = vmatmul.f32.gmra.mxu0 %v684_v45 }
 0x21d   :  { %813 = vmatmul.f32.gmra.mxu1 %v684_v45  ;;  %v665_v47 = vpop.f32.mrf.mxu2  ;;  %v932_v45 = vld [vmem:[#allocation2 + $0x3e8] sm:$0xff] }
 0x21e   :  { %v673_v50 = vadd.f32 %v665_v47, %v625_v46  ;;  %v921_v46 = vld [vmem:[#allocation2 + $0x390] sm:$0xff]  ;;  %v922_v47 = vld [vmem:[#allocation2 + $0x398] sm:$0xff] }
 0x21f   :  { %960 = vmatpush.msra.mxu0 %v921_v46  ;;  %989 = vmatpush.msra.mxu1 %v922_v47  ;;  %v1503_v46 = vld [vmem:[%s2175_s9 + $0x30] sm:$0xff] }
 0x220   :  { %v681_v53 = vadd.f32 %v677_v49, %v673_v50  ;;  %v929_v49 = vld [vmem:[#allocation2 + $0x3d0] sm:$0xff]  ;;  %v926_v50 = vld [vmem:[#allocation2 + $0x3b8] sm:$0xff] }
 0x221   :  { %961 = vmatpush.msra.mxu0 %v918_v52 }
 0x222   :  { %v685_v54 = vmax.f32 %v681_v53, 0.0  ;;  %v919_v53 = vld [vmem:[#allocation2 + $0x380] sm:$0xff] }
 0x223   :  { %990 = vmatpush.msra.mxu1 %v919_v53 }
 0x224   :  { %758 = vmatmul.f32.gmra.mxu3 %v685_v54  ;;  %787 = vmatmul.f32.gmra.mxu0 %v685_v54 }
 0x225   :  { %816 = vmatmul.f32.gmra.mxu1 %v685_v54  ;;  %v668_v56 = vpop.f32.mrf.mxu2  ;;  %v920_v54 = vld [vmem:[#allocation2 + $0x388] sm:$0xff] }
 0x226   :  { %v674_v59 = vadd.f32 %v668_v56, %v628_v55  ;;  %v915_v55 = vld [vmem:[#allocation2 + $0x360] sm:$0xff]  ;;  %v916_v56 = vld [vmem:[#allocation2 + $0x368] sm:$0xff] }
 0x227   :  { %962 = vmatpush.msra.mxu0 %v915_v55  ;;  %991 = vmatpush.msra.mxu1 %v916_v56  ;;  %v1504_v56 = vld [vmem:[%s2175_s9 + $0x38] sm:$0xff] }
 0x228   :  { %v682_v60 = vadd.f32 %v678_v58, %v674_v59  ;;  %v917_v58 = vld [vmem:[#allocation2 + $0x370] sm:$0xff]  ;;  %v912_v59 = vld [vmem:[#allocation2 + $0x348] sm:$0xff] }
 0x229   :  { %963 = vmatpush.msra.mxu0 %v912_v59 }
 0x22a   :  { %v686_v61 = vmax.f32 %v682_v60, 0.0  ;;  %v913_v60 = vld [vmem:[#allocation2 + $0x350] sm:$0xff] }
 0x22b   :  { %992 = vmatpush.msra.mxu1 %v913_v60 }
 0x22c   :  { %761 = vmatmul.f32.gmra.mxu3 %v686_v61  ;;  %790 = vmatmul.f32.gmra.mxu0 %v686_v61 }
 0x22d   :  { %819 = vmatmul.f32.gmra.mxu1 %v686_v61  ;;  %v914_v61 = vld [vmem:[#allocation2 + $0x358] sm:$0xff] }
 0x291   :  { %v782_v15 = vpop.f32.mrf.mxu0 }
 0x292   :  { %v811_v2 = vpop.f32.mrf.mxu1 }
 0x297   :  { %v753_v3 = vpop.f32.mrf.mxu3 }
 0x299   :  { %v785_v24 = vpop.f32.mrf.mxu0 }
 0x29a   :  { %v814_v4 = vpop.f32.mrf.mxu1 }
 0x29f   :  { %v756_v6 = vpop.f32.mrf.mxu3 }
 0x2a1   :  { %v788_v57 = vpop.f32.mrf.mxu0 }
 0x2a2   :  { %v817_v7 = vpop.f32.mrf.mxu1 }
 0x2a7   :  { %v759_v8 = vpop.f32.mrf.mxu3 }
 0x2aa   :  { %v820_v11 = vpop.f32.mrf.mxu1 }
 0x2ab   :  { %864 = vmatpush.msrb.mxu3 %v820_v11  ;;  %v903_v11 = vld [vmem:[#allocation2 + $0x300] sm:$0xff] }
 0x2ad   :  { %865 = vmatpush.msrb.mxu3 %v817_v7  ;;  %v907_v7 = vld [vmem:[#allocation2 + $0x320] sm:$0xff] }
 0x2af   :  { %866 = vmatpush.msrb.mxu3 %v814_v4  ;;  %v762_v12 = vpop.f32.mrf.mxu3  ;;  %v911_v4 = vld [vmem:[#allocation2 + $0x340] sm:$0xff] }
 0x2b0   :  { %835 = vmatpush.msrb.mxu2 %v762_v12  ;;  %v904_v12 = vld [vmem:[#allocation2 + $0x308] sm:$0xff] }
 0x2b1   :  { %867 = vmatpush.msrb.mxu3 %v811_v2  ;;  %v909_v2 = vld [vmem:[#allocation2 + $0x330] sm:$0xff] }
 0x2b2   :  { %836 = vmatpush.msrb.mxu2 %v759_v8  ;;  %1497 = vmatmul.msk.f32.vlgmr.msrb.gmra.mxu3 %vm351_vm0, %v1986_v35  ;;  %v908_v8 = vld [vmem:[#allocation2 + $0x328] sm:$0xff] }
 0x2b3   :  { %964 = vmatpush.msra.mxu0 %v909_v2 }
 0x2b4   :  { %837 = vmatpush.msrb.mxu2 %v756_v6  ;;  %v906_v6 = vld [vmem:[#allocation2 + $0x318] sm:$0xff] }
 0x2b5   :  { %965 = vmatpush.msra.mxu0 %v906_v6 }
 0x2b6   :  { %838 = vmatpush.msrb.mxu2 %v753_v3  ;;  %v910_v3 = vld [vmem:[#allocation2 + $0x338] sm:$0xff] }
 0x2b7   :  { %1493 = vmatmul.msk.f32.vlgmr.msrb.gmra.mxu2 %vm351_vm0, %v1955_v18  ;;  %993 = vmatpush.msra.mxu1 %v910_v3 }
 0x2b8   :  { %1009 = vmatpush.msra.mxu2 %v950_v27  ;;  %966 = vmatpush.msra.mxu0 %v903_v11 }
 0x2b9   :  { %994 = vmatpush.msra.mxu1 %v907_v7 }
 0x2ba   :  { %1498 = vmatmul.msk.f32.gmra.mxu3 %vm351_vm0, %v1993_v48  ;;  %1010 = vmatpush.msra.mxu2 %v947_v30 }
 0x2bb   :  { %995 = vmatpush.msra.mxu1 %v904_v12  ;;  %v1159_v12 = vld [vmem:[#allocation2 + $0x5e8] sm:$0xff] }
 0x2bc   :  { %1011 = vmatpush.msra.mxu2 %v944_v33 }
 0x2bd   :  { %1162 = vmatpush.msrb.mxu1 %v1159_v12 }
 0x2be   :  { %1012 = vmatpush.msra.mxu2 %v941_v37  ;;  %v1502_v37 = vld [vmem:[%s2175_s9 + $0x28] sm:$0xff] }
 0x2bf   :  { %1494 = vmatmul.msk.f32.gmra.mxu2 %vm351_vm0, %v1963_v21 }
 0x2c0   :  { %1013 = vmatpush.msra.mxu2 %v938_v39  ;;  %v435_v39 = vld [vmem:[%s2169_s3 + $0x8] sm:$0xff] }
 0x2c1   :  { %v439_v41 = vadd.f32 %v435_v39, %v1945_v1  ;;  %v1143_v39 = vld [vmem:[#allocation2 + $0x568] sm:$0xff] }
 0x2c2   :  { %1499 = vmatmul.msk.f32.gmra.mxu3 %vm351_vm0, %v2000_v62  ;;  %1014 = vmatpush.msra.mxu2 %v935_v42 }
 0x2c4   :  { %1015 = vmatpush.msra.mxu2 %v932_v45 }
 0x2c6   :  { %1016 = vmatpush.msra.mxu2 %v929_v49  ;;  %v436_v49 = vld [vmem:[%s2169_s3 + $0x10] sm:$0xff] }
 0x2c7   :  { %1495 = vmatmul.msk.f32.gmra.mxu2 %vm351_vm0, %v1971_v23 }
 0x2c8   :  { %1017 = vmatpush.msra.mxu2 %v926_v50  ;;  %v791_v50 = vpop.f32.mrf.mxu0 }
 0x2ca   :  { %1500 = vmatmul.msk.f32.gmra.mxu3 %vm351_vm0, %v2007_v63  ;;  %1018 = vmatpush.msra.mxu2 %v923_v51 }
 0x2cc   :  { %1019 = vmatpush.msra.mxu2 %v920_v54 }
 0x2ce   :  { %1020 = vmatpush.msra.mxu2 %v917_v58  ;;  %v432_v58 = vadd.f32 %v2011_v26, %v1949_v13 }
 0x2cf   :  { %1496 = vmatmul.msk.f32.gmra.mxu2 %vm351_vm0, %v1979_v25 }
 0x2d0   :  { %1021 = vmatpush.msra.mxu2 %v914_v61 }
 0x2d2   :  { %1022 = vmatpush.msra.mxu2 %v911_v4 }
 0x2d4   :  { %1023 = vmatpush.msra.mxu2 %v908_v8 }
 0x2d6   :  { %1024 = vmatpush.msra.mxu2 %v905_v14  ;;  %v1161_v14 = vld [vmem:[#allocation2 + $0x5f8] sm:$0xff] }
 0x335   :  { %v869_v16 = vpop.f32.mrf.mxu3 }
 0x33a   :  { %v840_v17 = vpop.f32.mrf.mxu2 }
 0x33b   :  { %v841_v20 = vadd.f32 %v840_v17, %v782_v15  ;;  %v1156_v15 = vld [vmem:[#allocation2 + $0x5d0] sm:$0xff]  ;;  %v1158_v17 = vld [vmem:[#allocation2 + $0x5e0] sm:$0xff] }
 0x33c   :  { %1163 = vmatpush.msrb.mxu1 %v1156_v15 }
 0x33d   :  { %v881_v27 = vadd.f32 %v869_v16, %v841_v20  ;;  %v872_v29 = vpop.f32.mrf.mxu3  ;;  %v1157_v16 = vld [vmem:[#allocation2 + $0x5d8] sm:$0xff] }
 0x33e   :  { %v1153_v20 = vld [vmem:[#allocation2 + $0x5b8] sm:$0xff] }
 0x33f   :  { %v890_v30 = vadd.f32 %v1501_v22, %v881_v27  ;;  %v1154_v22 = vld [vmem:[#allocation2 + $0x5c0] sm:$0xff]  ;;  %1164 = vmatpush.msrb.mxu1 %v1153_v20 }
 0x340   :  { %v1150_v27 = vld [vmem:[#allocation2 + $0x5a0] sm:$0xff] }
 0x341   :  { %v2049_v32 = vadd.f32 %v890_v30, %v1886_v0  ;;  %1165 = vmatpush.msrb.mxu1 %v1150_v27  ;;  %v1148_v30 = vld [vmem:[#allocation2 + $0x590] sm:$0xff] }
 0x342   :  { %v843_v33 = vpop.f32.mrf.mxu2 }
 0x343   :  { %v898_v34 = vadd.f32 %v2049_v32, %v438_v31  ;;  %v844_v36 = vadd.f32 %v843_v33, %v785_v24  ;;  %v1155_v24 = vld [vmem:[#allocation2 + $0x5c8] sm:$0xff]  ;;  %v1149_v31 = vld [vmem:[#allocation2 + $0x598] sm:$0xff]  ;;  %v1144_v33 = vld [vmem:[#allocation2 + $0x570] sm:$0xff] }
 0x345   :  { %v882_v38 = vadd.f32 %v872_v29, %v844_v36  ;;  %967 = vmatmul.f32.vlgmr.msra.gmra.mxu0 %v898_v34  ;;  %996 = vmatmul.f32.vlgmr.msra.gmra.mxu1 %v898_v34  ;;  %v875_v0 = vpop.f32.mrf.mxu3  ;;  %v1147_v29 = vld [vmem:[#allocation2 + $0x588] sm:$0xff]  ;;  %v1146_v36 = vld [vmem:[#allocation2 + $0x580] sm:$0xff] }
 0x346   :  { %1025 = vmatmul.f32.vlgmr.msra.gmra.mxu2 %v898_v34  ;;  %1166 = vmatpush.msrb.mxu1 %v1147_v29  ;;  %v1145_v34 = vld [vmem:[#allocation2 + $0x578] sm:$0xff]  ;;  %v1515_v29 = vld [vmem:[%s2175_s9 + $0x50] sm:$0xff] }
 0x347   :  { %v891_v40 = vadd.f32 %v1502_v37, %v882_v38  ;;  %v1141_v37 = vld [vmem:[#allocation2 + $0x558] sm:$0xff]  ;;  %v1142_v38 = vld [vmem:[#allocation2 + $0x560] sm:$0xff] }
 0x348   :  { %1167 = vmatpush.msrb.mxu1 %v1144_v33 }
 0x349   :  { %v2060_v42 = vadd.f32 %v891_v40, %v1892_v5  ;;  %v440_v5 = vadd.f32 %v436_v49, %v1947_v9  ;;  %v1139_v40 = vld [vmem:[#allocation2 + $0x548] sm:$0xff]  ;;  %v1130_v49 = vld [vmem:[#allocation2 + $0x500] sm:$0xff] }
 0x34a   :  { %v846_v43 = vpop.f32.mrf.mxu2  ;;  %1168 = vmatpush.msrb.mxu1 %v1141_v37 }
 0x34b   :  { %v847_v44 = vadd.f32 %v846_v43, %v788_v57  ;;  %v899_v45 = vadd.f32 %v2060_v42, %v439_v41  ;;  %v1138_v57 = vld [vmem:[#allocation2 + $0x540] sm:$0xff]  ;;  %v1136_v41 = vld [vmem:[#allocation2 + $0x530] sm:$0xff]  ;;  %v1137_v43 = vld [vmem:[#allocation2 + $0x538] sm:$0xff] }
 0x34c   :  { %1169 = vmatpush.msrb.mxu1 %v1138_v57 }
 0x34d   :  { %v883_v47 = vadd.f32 %v875_v0, %v847_v44  ;;  %970 = vmatmul.f32.gmra.mxu0 %v899_v45  ;;  %999 = vmatmul.f32.gmra.mxu1 %v899_v45  ;;  %v878_v53 = vpop.f32.mrf.mxu3  ;;  %v1135_v0 = vld [vmem:[#allocation2 + $0x528] sm:$0xff]  ;;  %v1132_v44 = vld [vmem:[#allocation2 + $0x510] sm:$0xff] }
 0x34e   :  { %1028 = vmatmul.f32.gmra.mxu2 %v899_v45  ;;  %1170 = vmatpush.msrb.mxu1 %v1135_v0  ;;  %v1133_v45 = vld [vmem:[#allocation2 + $0x518] sm:$0xff] }
 0x34f   :  { %v892_v1 = vadd.f32 %v1503_v46, %v883_v47  ;;  %v1134_v46 = vld [vmem:[#allocation2 + $0x520] sm:$0xff]  ;;  %v1129_v47 = vld [vmem:[#allocation2 + $0x4f8] sm:$0xff] }
 0x350   :  { %1171 = vmatpush.msrb.mxu1 %v1132_v44 }
 0x351   :  { %v2071_v51 = vadd.f32 %v892_v1, %v1898_v10  ;;  %v437_v10 = vld [vmem:[%s2169_s3 + $0x18] sm:$0xff]  ;;  %v1131_v1 = vld [vmem:[#allocation2 + $0x508] sm:$0xff] }
 0x352   :  { %v849_v52 = vpop.f32.mrf.mxu2  ;;  %v441_v60 = vadd.f32 %v437_v10, %v432_v58  ;;  %1172 = vmatpush.msrb.mxu1 %v1129_v47  ;;  %v1122_v58 = vld [vmem:[#allocation2 + $0x4c0] sm:$0xff]  ;;  %v1119_v10 = vld [vmem:[#allocation2 + $0x4a8] sm:$0xff] }
 0x353   :  { %v850_v54 = vadd.f32 %v849_v52, %v791_v50  ;;  %v900_v55 = vadd.f32 %v2071_v51, %v440_v5  ;;  %v1127_v5 = vld [vmem:[#allocation2 + $0x4e8] sm:$0xff]  ;;  %v1128_v50 = vld [vmem:[#allocation2 + $0x4f0] sm:$0xff] }
 0x354   :  { %v1123_v52 = vld [vmem:[#allocation2 + $0x4c8] sm:$0xff] }
 0x355   :  { %v884_v59 = vadd.f32 %v878_v53, %v850_v54  ;;  %973 = vmatmul.f32.gmra.mxu0 %v900_v55  ;;  %1002 = vmatmul.f32.gmra.mxu1 %v900_v55  ;;  %v1124_v53 = vld [vmem:[#allocation2 + $0x4d0] sm:$0xff]  ;;  %v1125_v54 = vld [vmem:[#allocation2 + $0x4d8] sm:$0xff] }
 0x356   :  { %1031 = vmatmul.f32.gmra.mxu2 %v900_v55  ;;  %v1120_v55 = vld [vmem:[#allocation2 + $0x4b0] sm:$0xff] }
 0x357   :  { %v893_v9 = vadd.f32 %v1504_v56, %v884_v59  ;;  %v1121_v56 = vld [vmem:[#allocation2 + $0x4b8] sm:$0xff]  ;;  %v1118_v59 = vld [vmem:[#allocation2 + $0x4a0] sm:$0xff] }
 0x359   :  { %v2083_v61 = vadd.f32 %v893_v9, %v1904_v19  ;;  %v1160_v19 = vld [vmem:[#allocation2 + $0x5f0] sm:$0xff]  ;;  %v1114_v9 = vld [vmem:[#allocation2 + $0x480] sm:$0xff] }
 0x35a   :  { %1191 = vmatpush.msrb.mxu2 %v1160_v19 }
 0x35b   :  { %v901_v2 = vadd.f32 %v2083_v61, %v441_v60  ;;  %v1115_v60 = vld [vmem:[#allocation2 + $0x488] sm:$0xff] }
 0x35c   :  { %1192 = vmatpush.msrb.mxu2 %v1157_v16  ;;  %v1514_v16 = vld [vmem:[%s2175_s9 + $0x48] sm:$0xff] }
 0x35d   :  { %976 = vmatmul.f32.gmra.mxu0 %v901_v2  ;;  %1005 = vmatmul.f32.gmra.mxu1 %v901_v2 }
 0x35e   :  { %1034 = vmatmul.f32.gmra.mxu2 %v901_v2  ;;  %v1116_v2 = vld [vmem:[#allocation2 + $0x490] sm:$0xff] }
 0x35f   :  { %1193 = vmatpush.msrb.mxu2 %v1154_v22 }
 0x361   :  { %1194 = vmatpush.msrb.mxu2 %v1151_v28 }
 0x363   :  { %1195 = vmatpush.msrb.mxu2 %v1148_v30 }
 0x365   :  { %1196 = vmatpush.msrb.mxu2 %v1145_v34 }
 0x367   :  { %1197 = vmatpush.msrb.mxu2 %v1142_v38 }
 0x369   :  { %1198 = vmatpush.msrb.mxu2 %v1139_v40 }
 0x36b   :  { %1199 = vmatpush.msrb.mxu2 %v1136_v41 }
 0x36d   :  { %1200 = vmatpush.msrb.mxu2 %v1133_v45 }
 0x36f   :  { %1201 = vmatpush.msrb.mxu2 %v1130_v49 }
 0x371   :  { %1202 = vmatpush.msrb.mxu2 %v1127_v5  ;;  %v1578_v5 = vld [vmem:[%s2172_s6 + $0x8] sm:$0xff] }
 0x373   :  { %1203 = vmatpush.msrb.mxu2 %v1124_v53 }
 0x375   :  { %1204 = vmatpush.msrb.mxu2 %v1121_v56 }
 0x377   :  { %1205 = vmatpush.msrb.mxu2 %v1118_v59 }
 0x379   :  { %1206 = vmatpush.msrb.mxu2 %v1115_v60 }
 0x3c2   :  { %v968_v3 = vpop.f32.mrf.mxu0 }
 0x3c9   :  { %v1026_v13 = vpop.f32.mrf.mxu2 }
 0x3ca   :  { %v971_v26 = vpop.f32.mrf.mxu0 }
 0x3d1   :  { %v1029_v4 = vpop.f32.mrf.mxu2 }
 0x3d2   :  { %v974_v6 = vpop.f32.mrf.mxu0 }
 0x3d9   :  { %v1032_v7 = vpop.f32.mrf.mxu2 }
 0x3da   :  { %v977_v8 = vpop.f32.mrf.mxu0 }
 0x3db   :  { %1050 = vmatpush.msra.mxu3 %v977_v8 }
 0x3dd   :  { %1051 = vmatpush.msra.mxu3 %v974_v6  ;;  %v1513_v6 = vld [vmem:[%s2175_s9 + $0x40] sm:$0xff] }
 0x3df   :  { %1052 = vmatpush.msra.mxu3 %v971_v26 }
 0x3e1   :  { %v1035_v11 = vpop.f32.mrf.mxu2  ;;  %1053 = vmatpush.msra.mxu3 %v968_v3  ;;  %v997_v3 = vpop.f32.mrf.mxu1 }
 0x3e2   :  { %1079 = vmatpush.msrb.mxu0 %v1035_v11  ;;  %1505 = vmatmul.msk.f32.vlgmr.msra.gmra.mxu3 %vm351_vm0, %v1955_v18  ;;  %v1152_v18 = vld [vmem:[#allocation2 + $0x5b0] sm:$0xff] }
 0x3e3   :  { %1220 = vmatpush.msrb.mxu3 %v1161_v14 }
 0x3e4   :  { %1080 = vmatpush.msrb.mxu0 %v1032_v7 }
 0x3e5   :  { %1221 = vmatpush.msrb.mxu3 %v1158_v17 }
 0x3e6   :  { %1081 = vmatpush.msrb.mxu0 %v1029_v4 }
 0x3e7   :  { %1222 = vmatpush.msrb.mxu3 %v1155_v24 }
 0x3e8   :  { %1082 = vmatpush.msrb.mxu0 %v1026_v13 }
 0x3e9   :  { %1509 = vmatmul.msk.f32.vlgmr.msrb.gmra.mxu0 %vm351_vm0, %v1986_v35  ;;  %1223 = vmatpush.msrb.mxu3 %v1152_v18  ;;  %v1000_v8 = vpop.f32.mrf.mxu1 }
 0x3ea   :  { %1506 = vmatmul.msk.f32.gmra.mxu3 %vm351_vm0, %v1963_v21  ;;  %v1140_v21 = vld [vmem:[#allocation2 + $0x550] sm:$0xff] }
 0x3eb   :  { %1224 = vmatpush.msrb.mxu3 %v1149_v31 }
 0x3ed   :  { %1225 = vmatpush.msrb.mxu3 %v1146_v36 }
 0x3ef   :  { %1226 = vmatpush.msrb.mxu3 %v1143_v39  ;;  %v1516_v39 = vld [vmem:[%s2175_s9 + $0x58] sm:$0xff] }
 0x3f1   :  { %1510 = vmatmul.msk.f32.gmra.mxu0 %vm351_vm0, %v1993_v48  ;;  %1227 = vmatpush.msrb.mxu3 %v1140_v21  ;;  %v1003_v22 = vpop.f32.mrf.mxu1 }
 0x3f2   :  { %1507 = vmatmul.msk.f32.gmra.mxu3 %vm351_vm0, %v1971_v23  ;;  %v1126_v23 = vld [vmem:[#allocation2 + $0x4e0] sm:$0xff] }
 0x3f3   :  { %1228 = vmatpush.msrb.mxu3 %v1137_v43  ;;  %1173 = vmatpush.msrb.mxu1 %v1126_v23  ;;  %v1577_v23 = vld [vmem:[%s2172_s6 + $0x10] sm:$0xff] }
 0x3f5   :  { %1229 = vmatpush.msrb.mxu3 %v1134_v46  ;;  %1174 = vmatpush.msrb.mxu1 %v1123_v52 }
 0x3f7   :  { %1230 = vmatpush.msrb.mxu3 %v1131_v1  ;;  %1175 = vmatpush.msrb.mxu1 %v1120_v55  ;;  %v1576_v1 = vld [vmem:[%s2172_s6] sm:$0xff] }
 0x3f9   :  { %1511 = vmatmul.msk.f32.gmra.mxu0 %vm351_vm0, %v2000_v62  ;;  %1231 = vmatpush.msrb.mxu3 %v1128_v50  ;;  %v1006_v34 = vpop.f32.mrf.mxu1  ;;  %v1579_v50 = vld [vmem:[%s2172_s6 + $0x18] sm:$0xff] }
 0x3fa   :  { %1508 = vmatmul.msk.f32.gmra.mxu3 %vm351_vm0, %v1979_v25  ;;  %v1117_v25 = vld [vmem:[#allocation2 + $0x498] sm:$0xff] }
 0x3fb   :  { %1232 = vmatpush.msrb.mxu3 %v1125_v54  ;;  %1176 = vmatpush.msrb.mxu1 %v1117_v25  ;;  %v1525_v25 = vld [vmem:[%s2175_s9 + $0x60] sm:$0xff] }
 0x3fd   :  { %1233 = vmatpush.msrb.mxu3 %v1122_v58  ;;  %1177 = vmatpush.msrb.mxu1 %v1114_v9 }
 0x3ff   :  { %1234 = vmatpush.msrb.mxu3 %v1119_v10 }
 0x401   :  { %1512 = vmatmul.msk.f32.gmra.mxu0 %vm351_vm0, %v2007_v63  ;;  %1235 = vmatpush.msrb.mxu3 %v1116_v2 }
 0x465   :  { %v1055_v13 = vpop.f32.mrf.mxu3 }
 0x466   :  { %v1056_v26 = vadd.f32 %v1055_v13, %v997_v3  ;;  %v1084_v4 = vpop.f32.mrf.mxu0 }
 0x468   :  { %v1096_v7 = vadd.f32 %v1084_v4, %v1056_v26  ;;  %v1526_v4 = vld [vmem:[%s2175_s9 + $0x68] sm:$0xff] }
 0x46a   :  { %v1105_v11 = vadd.f32 %v1513_v6, %v1096_v7 }
 0x46c   :  { %v1109_v12 = vmax.f32 %v1105_v11, 0.0 }
 0x46d   :  { %v1058_v19 = vpop.f32.mrf.mxu3 }
 0x46e   :  { %v1059_v14 = vadd.f32 %v1058_v19, %v1000_v8  ;;  %1178 = vmatmul.f32.vlgmr.msrb.gmra.mxu1 %v1109_v12  ;;  %1207 = vmatmul.f32.vlgmr.msrb.gmra.mxu2 %v1109_v12  ;;  %v1087_v15 = vpop.f32.mrf.mxu0 }
 0x46f   :  { %1236 = vmatmul.f32.vlgmr.msrb.gmra.mxu3 %v1109_v12 }
 0x470   :  { %v1097_v17 = vadd.f32 %v1087_v15, %v1059_v14  ;;  %v1528_v15 = vld [vmem:[%s2175_s9 + $0x78] sm:$0xff] }
 0x472   :  { %v1106_v20 = vadd.f32 %v1514_v16, %v1097_v17 }
 0x474   :  { %v1110_v24 = vmax.f32 %v1106_v20, 0.0 }
 0x475   :  { %v1061_v27 = vpop.f32.mrf.mxu3 }
 0x476   :  { %v1062_v28 = vadd.f32 %v1061_v27, %v1003_v22  ;;  %1181 = vmatmul.f32.gmra.mxu1 %v1110_v24  ;;  %1210 = vmatmul.f32.gmra.mxu2 %v1110_v24  ;;  %v1090_v18 = vpop.f32.mrf.mxu0 }
 0x477   :  { %1239 = vmatmul.f32.gmra.mxu3 %v1110_v24 }
 0x478   :  { %v1098_v30 = vadd.f32 %v1090_v18, %v1062_v28 }
 0x47a   :  { %v1107_v31 = vadd.f32 %v1515_v29, %v1098_v30 }
 0x47c   :  { %v1111_v33 = vmax.f32 %v1107_v31, 0.0 }
 0x47d   :  { %v1064_v36 = vpop.f32.mrf.mxu3 }
 0x47e   :  { %v1065_v37 = vadd.f32 %v1064_v36, %v1006_v34  ;;  %1184 = vmatmul.f32.gmra.mxu1 %v1111_v33  ;;  %1213 = vmatmul.f32.gmra.mxu2 %v1111_v33  ;;  %v1093_v38 = vpop.f32.mrf.mxu0 }
 0x47f   :  { %1242 = vmatmul.f32.gmra.mxu3 %v1111_v33 }
 0x480   :  { %v1099_v57 = vadd.f32 %v1093_v38, %v1065_v37 }
 0x482   :  { %v1108_v40 = vadd.f32 %v1516_v39, %v1099_v57 }
 0x484   :  { %v1112_v21 = vmax.f32 %v1108_v40, 0.0 }
 0x486   :  { %1187 = vmatmul.f32.gmra.mxu1 %v1112_v21  ;;  %1216 = vmatmul.f32.gmra.mxu2 %v1112_v21 }
 0x487   :  { %1245 = vmatmul.f32.gmra.mxu3 %v1112_v21 }
 0x4eb   :  { %v1179_v0 = vpop.f32.mrf.mxu1 }
 0x4f2   :  { %v1237_v41 = vpop.f32.mrf.mxu3 }
 0x4f3   :  { %v1182_v43 = vpop.f32.mrf.mxu1 }
 0x4fa   :  { %v1240_v44 = vpop.f32.mrf.mxu3 }
 0x4fb   :  { %v1185_v45 = vpop.f32.mrf.mxu1 }
 0x502   :  { %v1243_v46 = vpop.f32.mrf.mxu3 }
 0x503   :  { %v1188_v47 = vpop.f32.mrf.mxu1 }
 0x504   :  { %1261 = vmatpush.msra.mxu0 %v1188_v47  ;;  %1565 = vmatpush.msra.mxu2 %v1188_v47 }
 0x506   :  { %1262 = vmatpush.msra.mxu0 %v1185_v45  ;;  %1566 = vmatpush.msra.mxu2 %v1185_v45 }
 0x508   :  { %1263 = vmatpush.msra.mxu0 %v1182_v43  ;;  %1567 = vmatpush.msra.mxu2 %v1182_v43 }
 0x50a   :  { %v1246_v49 = vpop.f32.mrf.mxu3  ;;  %1264 = vmatpush.msra.mxu0 %v1179_v0  ;;  %1568 = vmatpush.msra.mxu2 %v1179_v0 }
 0x50b   :  { %1290 = vmatpush.msra.mxu1 %v1246_v49  ;;  %1569 = vmatpush.msra.mxu3 %v1246_v49 }
 0x50c   :  { %1517 = vmatmul.msk.f32.vlgmr.msra.gmra.mxu0 %vm351_vm0, %v1576_v1  ;;  %1519 = vmatmul.msk.f32.vlgmr.msra.gmra.mxu2 %vm351_vm0, %v1577_v23 }
 0x50d   :  { %1291 = vmatpush.msra.mxu1 %v1243_v46  ;;  %1570 = vmatpush.msra.mxu3 %v1243_v46 }
 0x50f   :  { %1292 = vmatpush.msra.mxu1 %v1240_v44  ;;  %1571 = vmatpush.msra.mxu3 %v1240_v44 }
 0x511   :  { %1293 = vmatpush.msra.mxu1 %v1237_v41  ;;  %1572 = vmatpush.msra.mxu3 %v1237_v41 }
 0x512   :  { %1521 = vmatmul.msk.f32.vlgmr.msra.gmra.mxu1 %vm351_vm0, %v1986_v35  ;;  %1523 = vmatmul.msk.f32.vlgmr.msra.gmra.mxu3 %vm351_vm0, %v2000_v62  ;;  %v1208_v35 = vpop.f32.mrf.mxu2 }
 0x514   :  { %1518 = vmatmul.msk.f32.gmra.mxu0 %vm351_vm0, %v1578_v5  ;;  %1520 = vmatmul.msk.f32.gmra.mxu2 %vm351_vm0, %v1579_v50 }
 0x51a   :  { %1522 = vmatmul.msk.f32.gmra.mxu1 %vm351_vm0, %v1993_v48  ;;  %1524 = vmatmul.msk.f32.gmra.mxu3 %vm351_vm0, %v2007_v63  ;;  %v1211_v62 = vpop.f32.mrf.mxu2  ;;  %v1527_v63 = vld [vmem:[%s2175_s9 + $0x70] sm:$0xff] }
 0x522   :  { %v1214_v52 = vpop.f32.mrf.mxu2 }
 0x52a   :  { %v1217_v53 = vpop.f32.mrf.mxu2 }
 0x589   :  { %v1266_v54 = vpop.f32.mrf.mxu0 }
 0x58a   :  { %v1267_v55 = vadd.f32 %v1266_v54, %v1208_v35 }
 0x58f   :  { %v1272_v56 = vpop.f32.mrf.mxu2  ;;  %v1295_v58 = vpop.f32.mrf.mxu1 }
 0x590   :  { %v1307_v59 = vadd.f32 %v1295_v58, %v1267_v55  ;;  %v1273_v60 = vadd.f32 %v1272_v56, %v1214_v52 }
 0x591   :  { %v1269_v9 = vpop.f32.mrf.mxu0 }
 0x592   :  { %v1316_v10 = vadd.f32 %v1525_v25, %v1307_v59  ;;  %v1270_v3 = vadd.f32 %v1269_v9, %v1211_v62 }
 0x594   :  { %v1320_v48 = vadd.f32 %v1316_v10, %v2049_v32 }
 0x595   :  { %v1301_v2 = vpop.f32.mrf.mxu3 }
 0x596   :  { %1324 = vst [vmem:[%s2176_s10] sm:$0xff] %v1320_v48  ;;  %v1309_v13 = vadd.f32 %v1301_v2, %v1273_v60 }
 0x597   :  { %v1298_v26 = vpop.f32.mrf.mxu1  ;;  %v1275_v8 = vpop.f32.mrf.mxu2 }
 0x598   :  { %v1318_v6 = vadd.f32 %v1527_v63, %v1309_v13  ;;  %v1308_v7 = vadd.f32 %v1298_v26, %v1270_v3  ;;  %v1276_v12 = vadd.f32 %v1275_v8, %v1217_v53 }
 0x59a   :  { %v1322_v32 = vadd.f32 %v1318_v6, %v2071_v51  ;;  %v1317_v11 = vadd.f32 %v1526_v4, %v1308_v7 }
 0x59c   :  { %1326 = vst [vmem:[%s2176_s10 + $0x10] sm:$0xff] %v1322_v32  ;;  %v1321_v19 = vadd.f32 %v1317_v11, %v2060_v42 }
 0x59d   :  { %v1304_v14 = vpop.f32.mrf.mxu3 }
 0x59e   :  { %1325 = vst [vmem:[%s2176_s10 + $0x8] sm:$0xff] %v1321_v19  ;;  %v1310_v16 = vadd.f32 %v1304_v14, %v1276_v12 }
 0x5a0   :  { %v1319_v17 = vadd.f32 %v1528_v15, %v1310_v16 }
 0x5a2   :  { %v1323_v51 = vadd.f32 %v1319_v17, %v2083_v61 }
 0x5a4   :  { %1327 = vst [vmem:[%s2176_s10 + $0x18] sm:$0xff] %v1323_v51 }
 0x5a5   :  { %1332 = vsyncpa [#allocation3], 1 }

</bundles_post_ra>
